<compile_context>
chip_gen: v5e
topology: v5e:2x2
jax: 0.10.0
libtpu: 0.0.40
codegen_flags: <defaults>
</compile_context>

<pallas_src>
import functools

import jax
import jax.numpy as jnp
from jax.experimental import pallas as pl
from jax.experimental.pallas import tpu as pltpu


def highway_kernel(x_ref, w_ref, b_ref, o_ref):
    # x_ref: (TILE_M, E) f32   w_ref: (E, 2E) matmul dtype   b_ref: (1, 2E) f32
    x = x_ref[...]                                   # keep f32 copy for the skip path
    e = x.shape[-1]

    # Single fused MXU matmul: [TILE_M, E] @ [E, 2E] -> f32 accumulator.
    acc = jnp.dot(x.astype(w_ref.dtype), w_ref[...],
                  preferred_element_type=jnp.float32)
    # One broadcasted bias add on the concatenated (proj | gate) accumulator.
    acc = acc + b_ref[...]

    proj = jnp.maximum(acc[:, :e], 0.0)              # relu  (VPU)
    gate = jax.nn.sigmoid(acc[:, e:])                # sigmoid (EUP)

    # Highway combine: gate*proj + (1-gate)*x  ==  x + gate*(proj - x)
    o_ref[...] = (x + gate * (proj - x)).astype(o_ref.dtype)


def _round_up(n, m):
    return ((n + m - 1) // m) * m


@functools.partial(jax.jit, static_argnames=("matmul_dtype", "tile_m"))
def highway_forward(x, w_proj, b_proj, w_gate, b_gate,
                    *, matmul_dtype=jnp.bfloat16, tile_m=256):
    """Highway forward.

    x:      (B, E) float32   (B = sentence_length * batch, flattened upstream)
    w_*:    (E, E) PyTorch convention (out_features, in_features)
    b_*:    (E,)
    """
    B, E = x.shape

    # --- host-side glue (plain JAX): fuse + transpose weights once ----------
    # PyTorch does x @ W^T; kernel does x @ W, so pass W^T.  Concatenate the
    # two branches along the output dim -> (E, 2E) weight and (1, 2E) bias.
    w_fused = jnp.concatenate([w_proj.T, w_gate.T], axis=1).astype(matmul_dtype)
    b_fused = jnp.concatenate([b_proj, b_gate], axis=0).reshape(1, 2 * E)
    b_fused = b_fused.astype(jnp.float32)

    # --- batch tiling --------------------------------------------------------
    tm = int(tile_m)
    if B < tm:
        tm = max(8, _round_up(B, 8))       # keep the (8,128) tiling rule happy
    B_pad = _round_up(B, tm)
    if B_pad != B:
        x_in = jnp.pad(x, ((0, B_pad - B), (0, 0)))
    else:
        x_in = x

    grid = (pl.cdiv(B_pad, tm),)

    out = pl.pallas_call(
        highway_kernel,
        out_shape=jax.ShapeDtypeStruct((B_pad, E), x.dtype),
        grid=grid,
        in_specs=[
            pl.BlockSpec((tm, E), lambda i: (i, 0)),        # x: streamed per tile
            pl.BlockSpec((E, 2 * E), lambda i: (0, 0)),     # fused weight: resident
            pl.BlockSpec((1, 2 * E), lambda i: (0, 0)),     # fused bias: resident
        ],
        out_specs=pl.BlockSpec((tm, E), lambda i: (i, 0)),
        compiler_params=pltpu.CompilerParams(
            dimension_semantics=("parallel",),              # both TCs on v7x
        ),
    )(x_in, w_fused, b_fused)

    return out[:B] if B_pad != B else out


def highway_ref(x, w_proj, b_proj, w_gate, b_gate):
    proj = jax.nn.relu(x @ w_proj.T + b_proj)
    gate = jax.nn.sigmoid(x @ w_gate.T + b_gate)
    return gate * proj + (1.0 - gate) * x


if __name__ == "__main__":
    word_embed_size = 128        # E
    batch = 512                  # B = sentence_length * batch, flattened upstream

    key = jax.random.PRNGKey(0)
    kx, kwp, kbp, kwg, kbg = jax.random.split(key, 5)

    # Deterministic init (uniform bound 1/sqrt(in), akin to nn.Linear default).
    bound = 1.0 / (word_embed_size ** 0.5)
    x = jax.random.normal(kx, (batch, word_embed_size), dtype=jnp.float32)
    w_proj = jax.random.uniform(kwp, (word_embed_size, word_embed_size),
                                minval=-bound, maxval=bound, dtype=jnp.float32)
    b_proj = jax.random.uniform(kbp, (word_embed_size,),
                                minval=-bound, maxval=bound, dtype=jnp.float32)
    w_gate = jax.random.uniform(kwg, (word_embed_size, word_embed_size),
                                minval=-bound, maxval=bound, dtype=jnp.float32)
    b_gate = jax.random.uniform(kbg, (word_embed_size,),
                                minval=-bound, maxval=bound, dtype=jnp.float32)

    # bf16 MXU inputs (f32 accumulate + f32 epilogue): loosened tolerance.
    out = highway_forward(x, w_proj, b_proj, w_gate, b_gate)
    out = jax.block_until_ready(out)
    expected = highway_ref(x, w_proj, b_proj, w_gate, b_gate)
    assert out.shape == (batch, word_embed_size)
    assert jnp.allclose(out, expected, atol=2e-2, rtol=2e-2), "bf16 path mismatch"

    # Full-f32 matmul path: tight tolerance against the reference.
    out_f32 = highway_forward(x, w_proj, b_proj, w_gate, b_gate,
                              matmul_dtype=jnp.float32)
    out_f32 = jax.block_until_ready(out_f32)
    assert jnp.allclose(out_f32, expected, atol=1e-5, rtol=1e-5), "f32 path mismatch"

    print("KERNEL_OK")
</pallas_src>

<mosaic_0001>
module attributes {stable_mosaic.version = 11 : i64} {
  func.func @highway_kernel(%arg0: i32, %arg1: memref<256x128xf32, #tpu.memory_space<vmem>>, %arg2: memref<128x256xbf16, #tpu.memory_space<vmem>>, %arg3: memref<1x256xf32, #tpu.memory_space<vmem>>, %arg4: memref<256x128xf32, #tpu.memory_space<vmem>>) attributes {dimension_semantics = [#tpu.dimension_semantics<parallel>], iteration_bounds = array<i64: 2>, scalar_prefetch = 0 : i64, scratch_operands = 0 : i64, tpu.core_type = #tpu.core_type<tc>, window_params = [{transform_indices = @transform_0, window_bounds = array<i64: 256, 128>}, {pipeline_mode = #tpu.pipeline_mode<synchronous>, transform_indices = @transform_1, window_bounds = array<i64: 128, 256>}, {pipeline_mode = #tpu.pipeline_mode<synchronous>, transform_indices = @transform_2, window_bounds = array<i64: 1, 256>}, {transform_indices = @transform_3, window_bounds = array<i64: 256, 128>}]} {
    %c0 = arith.constant 0 : index
    %c0_0 = arith.constant 0 : index
    %0 = vector.load %arg1[%c0, %c0_0] : memref<256x128xf32, #tpu.memory_space<vmem>>, vector<256x128xf32>
    %1 = arith.truncf %0 : vector<256x128xf32> to vector<256x128xbf16>
    %c0_1 = arith.constant 0 : index
    %c0_2 = arith.constant 0 : index
    %2 = vector.load %arg2[%c0_1, %c0_2] : memref<128x256xbf16, #tpu.memory_space<vmem>>, vector<128x256xbf16>
    %cst = arith.constant dense<0.000000e+00> : vector<256x256xf32>
    %3 = tpu.matmul %1, %2, %cst {dimension_numbers = #tpu.dot_dimension_numbers<[1], [0], [0], [1], [0, 0, 1, 1], [], []>} : vector<256x128xbf16>, vector<128x256xbf16>, vector<256x256xf32> -> vector<256x256xf32>
    %c0_3 = arith.constant 0 : index
    %c0_4 = arith.constant 0 : index
    %4 = vector.load %arg3[%c0_3, %c0_4] : memref<1x256xf32, #tpu.memory_space<vmem>>, vector<1x256xf32>
    %5 = vector.broadcast %4 : vector<1x256xf32> to vector<256x256xf32>
    %6 = arith.addf %3, %5 : vector<256x256xf32>
    %7 = vector.extract_strided_slice %6 {offsets = [0, 0], sizes = [256, 128], strides = [1, 1]} : vector<256x256xf32> to vector<256x128xf32>
    %cst_5 = arith.constant 0.000000e+00 : f32
    %8 = vector.broadcast %cst_5 : f32 to vector<256x128xf32>
    %9 = arith.maximumf %7, %8 : vector<256x128xf32>
    %10 = vector.extract_strided_slice %6 {offsets = [0, 128], sizes = [256, 128], strides = [1, 1]} : vector<256x256xf32> to vector<256x128xf32>
    %11 = arith.negf %10 : vector<256x128xf32>
    %12 = math.exp %11 : vector<256x128xf32>
    %cst_6 = arith.constant 1.000000e+00 : f32
    %13 = vector.broadcast %cst_6 : f32 to vector<256x128xf32>
    %14 = arith.addf %13, %12 : vector<256x128xf32>
    %15 = arith.divf %13, %14 : vector<256x128xf32>
    %16 = arith.subf %9, %0 : vector<256x128xf32>
    %17 = arith.mulf %15, %16 : vector<256x128xf32>
    %18 = arith.addf %0, %17 : vector<256x128xf32>
    %c0_7 = arith.constant 0 : index
    %c0_8 = arith.constant 0 : index
    %19 = vector.load %arg4[%c0_7, %c0_8] : memref<256x128xf32, #tpu.memory_space<vmem>>, vector<256x128xf32>
    tpu.vector_store %arg4[%c0_7, %c0_8], %18 {strides = array<i32>} : memref<256x128xf32, #tpu.memory_space<vmem>>, vector<256x128xf32>,
    return
  }
  func.func @transform_0(%arg0: i32) -> (i32, i32) {
    %c0_i32 = arith.constant 0 : i32
    %c0_i32_0 = arith.constant 0 : i32
    return %arg0, %c0_i32 : i32, i32
  }
  func.func @transform_1(%arg0: i32) -> (i32, i32) {
    %c0_i32 = arith.constant 0 : i32
    %c0_i32_0 = arith.constant 0 : i32
    %c0_i32_1 = arith.constant 0 : i32
    return %c0_i32, %c0_i32_0 : i32, i32
  }
  func.func @transform_2(%arg0: i32) -> (i32, i32) {
    %c0_i32 = arith.constant 0 : i32
    %c0_i32_0 = arith.constant 0 : i32
    %c0_i32_1 = arith.constant 0 : i32
    return %c0_i32, %c0_i32_0 : i32, i32
  }
  func.func @transform_3(%arg0: i32) -> (i32, i32) {
    %c0_i32 = arith.constant 0 : i32
    %c0_i32_0 = arith.constant 0 : i32
    return %arg0, %c0_i32 : i32, i32
  }
}

</mosaic_0001>

<bundles_post_ra>
// kernel: highway_forward.1
= control target key start
LH: loop header
LB: loop body
LE: loop exit
PB: predicated region body
PF: predicated region fallthrough
CT: control target
= control target key end

     0   :  { %8 = vsyncpa [#allocation3], 0  ;;  %s2619_s0 = inlined_call_operand.vmem [shape: f32[512,128], index: 0, kind: input, shape index: {}]   ;;  %s2620_s1 = inlined_call_operand.vmem [shape: bf16[128,256], index: 1, kind: input, shape index: {}]   ;;  %s2621_s2 = inlined_call_operand.vmem [shape: f32[1,256], index: 2, kind: input, shape index: {}]   ;;  %s2622_s3 = inlined_call_operand.hbm [shape: f32[512,128], index: 3, kind: output, shape index: {}]  }
   0x1   :  { %10 = vsyncpa [#allocation3 + $0x1], 0  ;;  %s1760_s12 = smov 0   ;;  %s1762_s13 = smov 0  }
   0x2   :  { %s1764_s14 = smov 0   ;;  %s1766_s15 = smov 0  }
   0x3 LB: > { %s1781_s16 = sadd.s32 4294967295, %s1736_s15   ;;  %s1346_s17 = sadd.s32 4294967294, %s1736_s15   ;;  %s1736_s15 = sphi %s1766_s15, %s2668_s15   ;;  %s1732_s14 = sphi %s1764_s14, %s2667_s14   ;;  %s1728_s13 = sphi %s1762_s13, %s2666_s13   ;;  %s1724_s12 = sphi %s1760_s12, %s2665_s12  }
   0x4   : > { %s1785_s18 = sadd.s32 1, %s1736_s15   ;;  %s91_s19 = sadd.s32 1, %s1732_s14 }
   0x5   : > { %s88_s20 = ssub.s32 %s1736_s15, %s1785_s18  ;;  %p101_p0 = scmp.ne.s32.totalorder %s1732_s14, %s1728_s13 }
   0x6   : > { %p89_p1 = scmp.eq.s32.totalorder %s88_s20, 0  ;;  %p102_p2 = scmp.eq.s32.totalorder %s1781_s16, 1 }
   0x7   : > { %p107_p3 = scmp.ne.s32.totalorder %s1728_s13, %s1724_s12  ;;  %p108_p4 = scmp.eq.s32.totalorder %s1346_s17, 1 }
   0x8   : > { %s1796_s21 = scalar_select %p89_p1, %s1732_s14, %s91_s19  }
   0x9   : > { %p1798_p5 = por %p102_p2, %p101_p0  ;;  %p1802_p6 = por %p108_p4, %p107_p3 }
   0xa   : > { %p1349_p7 = scmp.ge.s32.totalorder %s1736_s15, 1  ;;  %p141_p8 = scmp.lt.s32.totalorder %s1736_s15, 3 }
   0xc   : > { %p142_p9 = pnand %p1349_p7, %p141_p8 }
   0xd   : > { %s1351_s7 = sshll.u32 (!%p142_p9), %s1781_s16, 5  ;;  %s1470_s28 = sshll.u32 (!%p142_p9), %s1781_s16, 8 }
   0xe   : > { %145 = sbr.rel (%p142_p9) target bundleno = 383 (0x17f), region = 32  ;;  %p166_p10 = scmp.lt.s32.totalorder (!%p142_p9), %s1351_s7, 63 }
   0xf   : > { %s1280_s30 = scalar_lea.hbm (!%p142_p9), %s2622_s3, %s1470_s28  ;;  %s1694_s10 = scalar_lea.hbm (!%p142_p9), %s2622_s3, 512 }
  0x10   : > { %s1283_s4 = sshll.u32 (!%p142_p9), %s1280_s30, 4  ;;  %s1284_s4 = int_to_ptr.hbm [resolvable:$true] %s1283_s4 }
  0x11   : > { %s1688_s6 = sshra.s32 (!%p142_p9), %s1284_s4, 4  ;;  %s1689_s6 = int_to_ptr.hbm [resolvable:$true] %s1688_s6 }
  0x12   : > { %s1690_s8 = scalar_lea.hbm (!%p142_p9), %s1689_s6, 256  ;;  %p1695_p0 = scmp.lt.s32.totalorder (!%p142_p9), %s1689_s6, %s2622_s3 }
  0x13   : > { %v1468_v0 = vld [vmem:[%s2620_s1 + $0x74] sm:$0xf]  ;;  %v1413_v1 = vld [vmem:[%s2620_s1 + $0x78] sm:$0xf0]  ;;  %v1466_v2 = vld [vmem:[%s2620_s1 + $0x64] sm:$0xf]  ;;  %p1691_p11 = scmp.ne.s32.totalorder %s1689_s6, %s1690_s8  ;;  %p1696_p1 = scmp.lt.s32.totalorder %s1694_s10, %s1690_s8 }
  0x14   : > { %v1416_v3 = vor.u32 %v1468_v0, %v1413_v1  ;;  %v1405_v4 = vld [vmem:[%s2620_s1 + $0x68] sm:$0xf0]  ;;  %v1411_v5 = vld [vmem:[%s2620_s1 + $0x70] sm:$0xf]  ;;  %v1464_v7 = vld [vmem:[%s2620_s1 + $0x54] sm:$0xf] }
  0x15   : > { %v1408_v6 = vor.u32 %v1466_v2, %v1405_v4  ;;  %v1469_v8 = vld [vmem:[%s2620_s1 + $0x74] sm:$0xf0]  ;;  %v1397_v9 = vld [vmem:[%s2620_s1 + $0x58] sm:$0xf0]  ;;  %v1403_v11 = vld [vmem:[%s2620_s1 + $0x60] sm:$0xf]  ;;  %p1692_p12 = pnand %p1691_p11, %p1798_p5  ;;  %p1697_p2 = por %p1696_p1, %p1695_p0 }
  0x16   : > { %411 = vmatpush.bf16.msra.mxu1 %v1416_v3  ;;  %1479 = vmatpush.bf16.msra.mxu3 %v1416_v3  ;;  %v1412_v10 = vor.u32 %v1469_v8, %v1411_v5  ;;  %v1467_v12 = vld [vmem:[%s2620_s1 + $0x64] sm:$0xf0]  ;;  %v1400_v14 = vor.u32 %v1464_v7, %v1397_v9  ;;  %v1395_v15 = vld [vmem:[%s2620_s1 + $0x50] sm:$0xf]  ;;  %v1465_v16 = vld [vmem:[%s2620_s1 + $0x54] sm:$0xf0] }
  0x17   : > { %v1404_v13 = vor.u32 %v1467_v12, %v1403_v11  ;;  %v1462_v17 = vld [vmem:[%s2620_s1 + $0x44] sm:$0xf]  ;;  %v1389_v18 = vld [vmem:[%s2620_s1 + $0x48] sm:$0xf0]  ;;  %v1396_v19 = vor.u32 %v1465_v16, %v1395_v15  ;;  %v1387_v21 = vld [vmem:[%s2620_s1 + $0x40] sm:$0xf]  ;;  %p1693_p13 = pneg %p1692_p12 }
  0x18   : > { %1471 = vmatpush.bf16.msra.mxu2 %v1412_v10  ;;  %322 = vmatpush.bf16.msra.mxu0 %v1412_v10  ;;  %v1392_v20 = vor.u32 %v1462_v17, %v1389_v18  ;;  %v1463_v22 = vld [vmem:[%s2620_s1 + $0x44] sm:$0xf0]  ;;  %v1460_v23 = vld [vmem:[%s2620_s1 + $0x34] sm:$0xf]  ;;  %v1381_v24 = vld [vmem:[%s2620_s1 + $0x38] sm:$0xf0] }
  0x19   : > { %v1388_v25 = vor.u32 %v1463_v22, %v1387_v21  ;;  %v1384_v26 = vor.u32 %v1460_v23, %v1381_v24  ;;  %v1379_v27 = vld [vmem:[%s2620_s1 + $0x30] sm:$0xf]  ;;  %v1461_v28 = vld [vmem:[%s2620_s1 + $0x34] sm:$0xf0]  ;;  %v1458_v29 = vld [vmem:[%s2620_s1 + $0x24] sm:$0xf]  ;;  %p1698_p3 = pnand %p1697_p2, %p1693_p13 }
  0x1a   : > { %412 = vmatpush.bf16.msra.mxu1 %v1408_v6  ;;  %1480 = vmatpush.bf16.msra.mxu3 %v1408_v6  ;;  %v1373_v30 = vld [vmem:[%s2620_s1 + $0x28] sm:$0xf0]  ;;  %s2670_s7 = smov (!%p166_p10, %s1351_s7), 63  ;;  %v1380_v31 = vor.u32 %v1461_v28, %v1379_v27  ;;  %v1371_v33 = vld [vmem:[%s2620_s1 + $0x20] sm:$0xf] }
  0x1b   : > { %v1376_v32 = vor.u32 %v1458_v29, %v1373_v30  ;;  %v1459_v34 = vld [vmem:[%s2620_s1 + $0x24] sm:$0xf0]  ;;  %v1456_v35 = vld [vmem:[%s2620_s1 + $0x14] sm:$0xf]  ;;  %v1365_v36 = vld [vmem:[%s2620_s1 + $0x18] sm:$0xf0] }
  0x1c   : > { %1472 = vmatpush.bf16.msra.mxu2 %v1404_v13  ;;  %323 = vmatpush.bf16.msra.mxu0 %v1404_v13  ;;  %s1352_s24 = sshll.u32 %s2670_s7, 3  ;;  %v1372_v37 = vor.u32 %v1459_v34, %v1371_v33  ;;  %v1368_v38 = vor.u32 %v1456_v35, %v1365_v36  ;;  %v1363_v39 = vld [vmem:[%s2620_s1 + $0x10] sm:$0xf]  ;;  %v1457_v40 = vld [vmem:[%s2620_s1 + $0x14] sm:$0xf0] }
  0x1d   : > { %s1890_s27 = scalar_lea.vmem %s2619_s0, %s1352_s24  ;;  %v1454_v41 = vld [vmem:[%s2620_s1 + $0x4] sm:$0xf]  ;;  %v1357_v42 = vld [vmem:[%s2620_s1 + $0x8] sm:$0xf0]  ;;  %v1364_v44 = vor.u32 %v1457_v40, %v1363_v39  ;;  %v1355_v49 = vld [vmem:[%s2620_s1] sm:$0xf] }
  0x1e   : > { %413 = vmatpush.bf16.msra.mxu1 %v1400_v14  ;;  %1481 = vmatpush.bf16.msra.mxu3 %v1400_v14  ;;  %v1905_v43 = vld [vmem:[%s1890_s27] sm:$0xff]  ;;  %v1360_v45 = vor.u32 %v1454_v41, %v1357_v42  ;;  %v1908_v46 = vld [vmem:[%s1890_s27 + $0x8] sm:$0xff]  ;;  %v1927_v54 = vld [vmem:[%s1890_s27 + $0x10] sm:$0xff]  ;;  %s162_s24 = sand.u32 1, %s1728_s13  }
  0x1f   : > { %v1911_v47 = vld [vmem:[%s1890_s27 + $0x80] sm:$0xff]  ;;  %v1914_v48 = vld [vmem:[%s1890_s27 + $0x88] sm:$0xff]  ;;  %v204_v51 = vpack.c.bf16 %v1908_v46, %v1905_v43  ;;  %v1930_v55 = vld [vmem:[%s1890_s27 + $0x18] sm:$0xff]  ;;  %s2058_s25 = sshll.u32 %s162_s24, 8  ;;  %s1269_s5 = scalar_lea.sflag [#allocation3], %s162_s24 }
  0x20   : > { %1473 = vmatpush.bf16.msra.mxu2 %v1396_v19  ;;  %324 = vmatpush.bf16.msra.mxu0 %v1396_v19  ;;  %v1455_v50 = vld [vmem:[%s2620_s1 + $0x4] sm:$0xf0]  ;;  %v212_v52 = vpack.c.bf16 %v1914_v48, %v1911_v47  ;;  %v1933_v56 = vld [vmem:[%s1890_s27 + $0x90] sm:$0xff]  ;;  %v1936_v57 = vld [vmem:[%s1890_s27 + $0x98] sm:$0xff]  ;;  %v205_v58 = vpack.c.bf16 %v1930_v55, %v1927_v54  ;;  %s2085_s26 = scalar_lea.vmem [#allocation2], %s2058_s25 }
  0x21   : > { %v1356_v53 = vor.u32 %v1455_v50, %v1355_v49  ;;  %v213_v59 = vpack.c.bf16 %v1936_v57, %v1933_v56  ;;  %v1943_v60 = vld [vmem:[%s1890_s27 + $0x20] sm:$0xff]  ;;  %v1946_v61 = vld [vmem:[%s1890_s27 + $0x28] sm:$0xff]  ;;  %v1959_v2 = vld [vmem:[%s1890_s27 + $0x30] sm:$0xff]  ;;  %s1281_s16 = sshll.u32 %s2085_s26, 4  ;;  %s1282_s16 = int_to_ptr.vmem [resolvable:$true] %s1281_s16 }
  0x22   : > { %414 = vmatpush.bf16.msra.mxu1 %v1392_v20  ;;  %1482 = vmatpush.bf16.msra.mxu3 %v1392_v20  ;;  %v1949_v62 = vld [vmem:[%s1890_s27 + $0xa0] sm:$0xff]  ;;  %v1952_v63 = vld [vmem:[%s1890_s27 + $0xa8] sm:$0xff]  ;;  %v206_v0 = vpack.c.bf16 %v1946_v61, %v1943_v60  ;;  %v1962_v3 = vld [vmem:[%s1890_s27 + $0x38] sm:$0xff] }
  0x23   : > { %v214_v1 = vpack.c.bf16 %v1952_v63, %v1949_v62  ;;  %v1965_v4 = vld [vmem:[%s1890_s27 + $0xb0] sm:$0xff]  ;;  %v195_v5 = vld [vmem:[%s1890_s27 + $0xb8] sm:$0xff]  ;;  %v207_v6 = vpack.c.bf16 %v1962_v3, %v1959_v2  ;;  %v180_v8 = vld [vmem:[%s1890_s27 + $0x40] sm:$0xff] }
  0x24   : > { %1474 = vmatpush.bf16.msra.mxu2 %v1388_v25  ;;  %325 = vmatpush.bf16.msra.mxu0 %v1388_v25  ;;  %v215_v7 = vpack.c.bf16 %v195_v5, %v1965_v4  ;;  %v181_v9 = vld [vmem:[%s1890_s27 + $0x48] sm:$0xff]  ;;  %v196_v10 = vld [vmem:[%s1890_s27 + $0xc0] sm:$0xff]  ;;  %v182_v14 = vld [vmem:[%s1890_s27 + $0x50] sm:$0xff] }
  0x25   : > { %v197_v11 = vld [vmem:[%s1890_s27 + $0xc8] sm:$0xff]  ;;  %v208_v12 = vpack.c.bf16 %v181_v9, %v180_v8  ;;  %v183_v15 = vld [vmem:[%s1890_s27 + $0x58] sm:$0xff]  ;;  %v198_v16 = vld [vmem:[%s1890_s27 + $0xd0] sm:$0xff] }
  0x26   : > { %415 = vmatpush.bf16.msra.mxu1 %v1384_v26  ;;  %1483 = vmatpush.bf16.msra.mxu3 %v1384_v26  ;;  %v216_v13 = vpack.c.bf16 %v197_v11, %v196_v10  ;;  %v199_v17 = vld [vmem:[%s1890_s27 + $0xd8] sm:$0xff]  ;;  %v209_v18 = vpack.c.bf16 %v183_v15, %v182_v14  ;;  %v184_v20 = vld [vmem:[%s1890_s27 + $0x60] sm:$0xff]  ;;  %v185_v21 = vld [vmem:[%s1890_s27 + $0x68] sm:$0xff] }
  0x27   : > { %v217_v19 = vpack.c.bf16 %v199_v17, %v198_v16  ;;  %v200_v22 = vld [vmem:[%s1890_s27 + $0xe0] sm:$0xff]  ;;  %v201_v23 = vld [vmem:[%s1890_s27 + $0xe8] sm:$0xff]  ;;  %v210_v24 = vpack.c.bf16 %v185_v21, %v184_v20  ;;  %v186_v26 = vld [vmem:[%s1890_s27 + $0x70] sm:$0xff] }
  0x28   : > { %1475 = vmatpush.bf16.msra.mxu2 %v1380_v31  ;;  %326 = vmatpush.bf16.msra.mxu0 %v1380_v31  ;;  %v218_v25 = vpack.c.bf16 %v201_v23, %v200_v22  ;;  %v187_v27 = vld [vmem:[%s1890_s27 + $0x78] sm:$0xff]  ;;  %v202_v28 = vld [vmem:[%s1890_s27 + $0xf0] sm:$0xff] }
  0x29   : > { %v203_v29 = vld [vmem:[%s1890_s27 + $0xf8] sm:$0xff]  ;;  %v211_v30 = vpack.c.bf16 %v187_v27, %v186_v26 }
  0x2a   : > { %416 = vmatpush.bf16.msra.mxu1 %v1376_v32  ;;  %1484 = vmatpush.bf16.msra.mxu3 %v1376_v32  ;;  %v219_v31 = vpack.c.bf16 %v203_v29, %v202_v28  ;;  %v236_v32 = vld [vmem:[%s2621_s2] sm:$0x3] }
  0x2b   : > { %v1990_v33 = vperm.slane %v236_v32, 1 }
  0x2c   : > { %1476 = vmatpush.bf16.msra.mxu2 %v1372_v37  ;;  %327 = vmatpush.bf16.msra.mxu0 %v1372_v37 }
  0x2e   : > { %417 = vmatpush.bf16.msra.mxu1 %v1368_v38  ;;  %1485 = vmatpush.bf16.msra.mxu3 %v1368_v38 }
  0x30   : > { %1477 = vmatpush.bf16.msra.mxu2 %v1364_v44  ;;  %328 = vmatpush.bf16.msra.mxu0 %v1364_v44  ;;  %v1995_v44 = vperm.slane %v236_v32, 0 }
  0x32   : > { %418 = vmatpush.bf16.msra.mxu1 %v1360_v45  ;;  %1486 = vmatpush.bf16.msra.mxu3 %v1360_v45 }
  0x34   : > { %1478 = vmatpush.bf16.msra.mxu2 %v1356_v53  ;;  %329 = vmatpush.bf16.msra.mxu0 %v1356_v53 }
  0x35   : > { %419 = vmatmul.bf16.vlgmr.msra.gmra.mxu1 %v204_v51  ;;  %459 = vmatmul.bf16.vlgmr.msra.gmra.mxu3 %v212_v52 }
  0x37   : > { %370 = vmatmul.bf16.vlgmr.msra.gmra.mxu2 %v212_v52  ;;  %330 = vmatmul.bf16.vlgmr.msra.gmra.mxu0 %v204_v51 }
  0x45   : > { %424 = vmatmul.bf16.gmra.mxu1 %v205_v58  ;;  %464 = vmatmul.bf16.gmra.mxu3 %v213_v59 }
  0x47   : > { %375 = vmatmul.bf16.gmra.mxu2 %v213_v59  ;;  %335 = vmatmul.bf16.gmra.mxu0 %v205_v58 }
  0x55   : > { %429 = vmatmul.bf16.gmra.mxu1 %v206_v0  ;;  %469 = vmatmul.bf16.gmra.mxu3 %v214_v1 }
  0x57   : > { %380 = vmatmul.bf16.gmra.mxu2 %v214_v1  ;;  %340 = vmatmul.bf16.gmra.mxu0 %v206_v0 }
  0x65   : > { %434 = vmatmul.bf16.gmra.mxu1 %v207_v6  ;;  %474 = vmatmul.bf16.gmra.mxu3 %v215_v7 }
  0x67   : > { %385 = vmatmul.bf16.gmra.mxu2 %v215_v7  ;;  %345 = vmatmul.bf16.gmra.mxu0 %v207_v6 }
  0x75   : > { %439 = vmatmul.bf16.gmra.mxu1 %v208_v12  ;;  %479 = vmatmul.bf16.gmra.mxu3 %v216_v13 }
  0x77   : > { %390 = vmatmul.bf16.gmra.mxu2 %v216_v13  ;;  %350 = vmatmul.bf16.gmra.mxu0 %v208_v12 }
  0x85   : > { %444 = vmatmul.bf16.gmra.mxu1 %v209_v18  ;;  %484 = vmatmul.bf16.gmra.mxu3 %v217_v19 }
  0x87   : > { %395 = vmatmul.bf16.gmra.mxu2 %v217_v19  ;;  %355 = vmatmul.bf16.gmra.mxu0 %v209_v18 }
  0x95   : > { %449 = vmatmul.bf16.gmra.mxu1 %v210_v24  ;;  %489 = vmatmul.bf16.gmra.mxu3 %v218_v25 }
  0x97   : > { %400 = vmatmul.bf16.gmra.mxu2 %v218_v25  ;;  %360 = vmatmul.bf16.gmra.mxu0 %v210_v24 }
  0xa5   : > { %454 = vmatmul.bf16.gmra.mxu1 %v211_v30  ;;  %494 = vmatmul.bf16.gmra.mxu3 %v219_v31 }
  0xa7   : > { %405 = vmatmul.bf16.gmra.mxu2 %v219_v31  ;;  %365 = vmatmul.bf16.gmra.mxu0 %v211_v30 }
  0xb2   : > { %v420_v34 = vpop.f32.mrf.mxu1 }
  0xb3   : > { %v421_v35 = vadd.f32 %v420_v34, %v1990_v33 }
  0xb4   : > { %v331_v37 = vpop.f32.mrf.mxu0 }
  0xb5   : > { %v1417_v36 = vmul.f32 -1.442695, %v421_v35  ;;  %v332_v52 = vadd.f32 %v331_v37, %v1995_v44 }
  0xb7   : > { %1528 = vpow2.f32 %v1417_v36  ;;  %v500_v9 = vmax.f32 %v332_v52, 0.0 }
  0xb8   : > { %v460_v38 = vpop.f32.mrf.mxu3 }
  0xb9   : > { %v461_v39 = vadd.f32 %v460_v38, %v1990_v33  ;;  %v1140_v22 = vsub.f32 %v500_v9, %v1905_v43 }
  0xba   : > { %v422_v40 = vpop.f32.mrf.mxu1  ;;  %v371_v45 = vpop.f32.mrf.mxu2 }
  0xbb   : > { %v1433_v41 = vmul.f32 -1.442695, %v461_v39  ;;  %v423_v42 = vadd.f32 %v422_v40, %v1990_v33  ;;  %v372_v59 = vadd.f32 %v371_v45, %v1995_v44 }
  0xbc   : > { %v333_v53 = vpop.f32.mrf.mxu0 }
  0xbd   : > { %v1529_v49 = vpop.eup %1528  ;;  %1530 = vpow2.f32 %v1433_v41  ;;  %v1418_v50 = vmul.f32 -1.442695, %v423_v42  ;;  %v334_v5 = vadd.f32 %v333_v53, %v1995_v44  ;;  %v516_v12 = vmax.f32 %v372_v59, 0.0 }
  0xbe   : > { %v1997_v51 = vadd.f32 1.0, %v1529_v49 }
  0xbf   : > { %1532 = vpow2.f32 %v1418_v50  ;;  %v501_v19 = vmax.f32 %v334_v5, 0.0  ;;  %v2023_v25 = vsub.f32 %v516_v12, %v1911_v47 }
  0xc0   : > { %1534 = vrcp.f32 %v1997_v51  ;;  %v462_v58 = vpop.f32.mrf.mxu3  ;;  %v669_v11 = vand.u32 2147483647, %v1997_v51  ;;  %v671_v16 = vand.u32 2147483648, %v1997_v51  ;;  %vm665_vm0 = vweird.f32 %v1997_v51 }
  0xc1   : > { %v463_v0 = vadd.f32 %v462_v58, %v1990_v33  ;;  %v2029_v34 = vsub.f32 %v501_v19, %v1908_v46 }
  0xc2   : > { %v425_v1 = vpop.f32.mrf.mxu1  ;;  %v373_v13 = vpop.f32.mrf.mxu2  ;;  %vm2017_vm1 = vcmp.eq.f32.partialorder %v669_v11, 8.507059e+37  ;;  %v672_v31 = vor.u32 1.1754944e-38, %v671_v16 }
  0xc3   : > { %v1531_v6 = vpop.eup %1530  ;;  %v1434_v7 = vmul.f32 -1.442695, %v463_v0  ;;  %v426_v8 = vadd.f32 %v425_v1, %v1990_v33  ;;  %v374_v20 = vadd.f32 %v373_v13, %v1995_v44 }
  0xc4   : > { %v2005_v10 = vadd.f32 1.0, %v1531_v6  ;;  %v336_v41 = vpop.f32.mrf.mxu0 }
  0xc5   : > { %v1533_v14 = vpop.eup %1532  ;;  %1536 = vpow2.f32 %v1434_v7  ;;  %v1419_v15 = vmul.f32 -1.442695, %v426_v8  ;;  %v517_v35 = vmax.f32 %v374_v20, 0.0  ;;  %v2038_v50 = vadd.f32 %v336_v41, %v1995_v44 }
  0xc6   : > { %v1535_v17 = vpop.eup %1534  ;;  %1538 = vrcp.f32 %v2005_v10  ;;  %v2010_v18 = vadd.f32 1.0, %v1533_v14  ;;  %v911_v24 = vand.u32 2147483648, %v2005_v10  ;;  %v909_v28 = vand.u32 2147483647, %v2005_v10 }
  0xc7   : > { %v661_v21 = vmul.f32 %v1535_v17, %v1997_v51  ;;  %1540 = vpow2.f32 %v1419_v15  ;;  %vm666_vm2 = vweird.f32 %v1535_v17  ;;  %vm905_vm3 = vweird.f32 %v2005_v10 }
  0xc8   : > { %1542 = vrcp.f32 %v2010_v18  ;;  %v465_v26 = vpop.f32.mrf.mxu3  ;;  %v686_v30 = vand.u32 2147483648, %v2010_v18  ;;  %v684_v40 = vand.u32 2147483647, %v2010_v18  ;;  %v912_v49 = vor.u32 1.1754944e-38, %v911_v24  ;;  %vm667_vm6 = vmor %vm665_vm0, %vm666_vm2 }
  0xc9   : > { %v662_v27 = vsub.f32 1.0, %v661_v21  ;;  %v466_v29 = vadd.f32 %v465_v26, %v1990_v33  ;;  %vm2041_vm4 = vcmp.eq.f32.partialorder %v909_v28, 8.507059e+37  ;;  %vm680_vm5 = vweird.f32 %v2010_v18 }
  0xca   : > { %v427_v32 = vpop.f32.mrf.mxu1  ;;  %v687_v0 = vor.u32 1.1754944e-38, %v686_v30  ;;  %v2053_v7 = vsub.f32 %v517_v35, %v1914_v48  ;;  %vm2060_vm8 = vcmp.eq.f32.partialorder %v684_v40, 8.507059e+37  ;;  %v502_v26 = vmax.f32 %v2038_v50, 0.0 }
  0xcb   : > { %v1537_v36 = vpop.eup %1536  ;;  %v663_v37 = vmul.f32 %v1535_v17, %v662_v27  ;;  %v1435_v38 = vmul.f32 -1.442695, %v466_v29  ;;  %v428_v39 = vadd.f32 %v427_v32, %v1990_v33 }
  0xcc   : > { %v1539_v42 = vpop.eup %1538  ;;  %v2033_v45 = vadd.f32 1.0, %v1537_v36 }
  0xcd   : > { %v1541_v52 = vpop.eup %1540  ;;  %v901_v53 = vmul.f32 %v1539_v42, %v2005_v10  ;;  %v664_v58 = vadd.f32 %v1535_v17, %v663_v37  ;;  %1544 = vpow2.f32 %v1435_v38  ;;  %v1420_v6 = vmul.f32 -1.442695, %v428_v39 }
  0xce   : > { %v1543_v1 = vpop.eup %1542  ;;  %1546 = vrcp.f32 %v2033_v45  ;;  %v2047_v5 = vadd.f32 1.0, %v1541_v52  ;;  %vm906_vm7 = vweird.f32 %v1539_v42  ;;  %v924_v13 = vand.u32 2147483647, %v2033_v45 }
  0xcf   : > { %v902_v8 = vsub.f32 1.0, %v901_v53  ;;  %v676_v9 = vmul.f32 %v1543_v1, %v2010_v18  ;;  %v668_v11 = vsel %vm667_vm6, %v1535_v17, %v664_v58  ;;  %v926_v14 = vand.u32 2147483648, %v2033_v45  ;;  %vm907_vm11 = vmor %vm905_vm3, %vm906_vm7 }
  0xd0   : > { %1548 = vrcp.f32 %v2047_v5  ;;  %v673_v51 = vsel %vm2017_vm1, %v672_v31, %v668_v11  ;;  %v467_v15 = vpop.f32.mrf.mxu3  ;;  %vm681_vm9 = vweird.f32 %v1543_v1  ;;  %vm920_vm10 = vweird.f32 %v2033_v45 }
  0xd1   : > { %v677_v16 = vsub.f32 1.0, %v676_v9  ;;  %v1172_v19 = vmul.f32 %v1140_v22, %v673_v51  ;;  %v903_v20 = vmul.f32 %v1539_v42, %v902_v8  ;;  %1550 = vpow2.f32 %v1420_v6  ;;  %vm682_vm14 = vmor %vm680_vm5, %vm681_vm9 }
  0xd2   : > { %v2069_v17 = vor.u32 1.1754944e-38, %v926_v14  ;;  %v468_v21 = vadd.f32 %v467_v15, %v1990_v33  ;;  %v430_v24 = vpop.f32.mrf.mxu1  ;;  %vm695_vm12 = vweird.f32 %v2047_v5  ;;  %v699_v35 = vand.u32 2147483647, %v2047_v5 }
  0xd3   : > { %v1545_v23 = vpop.eup %1544  ;;  %v1204_v27 = vadd.f32 %v1172_v19, %v1905_v43  ;;  %v904_v28 = vadd.f32 %v1539_v42, %v903_v20  ;;  %v678_v29 = vmul.f32 %v1543_v1, %v677_v16  ;;  %v431_v22 = vadd.f32 %v430_v24, %v1990_v33 }
  0xd4   : > { %v1547_v30 = vpop.eup %1546  ;;  %v2079_v31 = vadd.f32 1.0, %v1545_v23  ;;  %v1436_v32 = vmul.f32 -1.442695, %v468_v21  ;;  %vm2088_vm13 = vcmp.eq.f32.partialorder %v924_v13, 8.507059e+37  ;;  %v701_v10 = vand.u32 2147483648, %v2047_v5 }
  0xd5   : > { %v916_v43 = vmul.f32 %v1547_v30, %v2033_v45  ;;  %1236 = vst [vmem:[%s2085_s26] sm:$0xff] %v1204_v27  ;;  %v908_v36 = vsel %vm907_vm11, %v1539_v42, %v904_v28  ;;  %v679_v37 = vadd.f32 %v1543_v1, %v678_v29  ;;  %vm921_vm15 = vweird.f32 %v1547_v30 }
  0xd6   : > { %v1549_v39 = vpop.eup %1548  ;;  %v913_v40 = vsel %vm2041_vm4, %v912_v49, %v908_v36  ;;  %1552 = vrcp.f32 %v2079_v31  ;;  %v1421_v41 = vmul.f32 -1.442695, %v431_v22  ;;  %vm2101_vm0 = vcmp.eq.f32.partialorder %v699_v35, 8.507059e+37  ;;  %vm922_vm2 = vmor %vm920_vm10, %vm921_vm15 }
  0xd7   : > { %v1551_v42 = vpop.eup %1550  ;;  %v917_v50 = vsub.f32 1.0, %v916_v43  ;;  %v691_v52 = vmul.f32 %v1549_v39, %v2047_v5  ;;  %v1188_v53 = vmul.f32 %v2023_v25, %v913_v40  ;;  %v683_v58 = vsel %vm682_vm14, %v1543_v1, %v679_v37  ;;  %v376_v25 = vpop.f32.mrf.mxu2 }
  0xd8   : > { %v2105_v49 = vadd.f32 1.0, %v1551_v42  ;;  %v688_v18 = vsel %vm2060_vm8, %v687_v0, %v683_v58  ;;  %1554 = vpow2.f32 %v1436_v32  ;;  %vm696_vm1 = vweird.f32 %v1549_v39  ;;  %v470_v19 = vpop.f32.mrf.mxu3 }
  0xd9   : > { %v692_v59 = vsub.f32 1.0, %v691_v52  ;;  %v1220_v8 = vadd.f32 %v1188_v53, %v1911_v47  ;;  %v1173_v9 = vmul.f32 %v2029_v34, %v688_v18  ;;  %v918_v11 = vmul.f32 %v1547_v30, %v917_v50  ;;  %vm697_vm5 = vmor %vm695_vm12, %vm696_vm1 }
  0xda   : > { %1556 = vrcp.f32 %v2105_v49  ;;  %v702_v1 = vor.u32 1.1754944e-38, %v701_v10  ;;  %v1142_v51 = vsub.f32 %v502_v26, %v1927_v54  ;;  %v377_v13 = vadd.f32 %v376_v25, %v1995_v44  ;;  %v432_v24 = vpop.f32.mrf.mxu1  ;;  %v338_v26 = vpop.f32.mrf.mxu0 }
  0xdb   : > { %1252 = vst [vmem:[%s2085_s26 + $0x80] sm:$0xff] %v1220_v8  ;;  %v1205_v0 = vadd.f32 %v1173_v9, %v1908_v46  ;;  %v919_v12 = vadd.f32 %v1547_v30, %v918_v11  ;;  %1558 = vpow2.f32 %v1421_v41  ;;  %v693_v14 = vmul.f32 %v1549_v39, %v692_v59 }
  0xdc   : > { %v1553_v15 = vpop.eup %1552  ;;  %v518_v47 = vmax.f32 %v377_v13, 0.0  ;;  %vm935_vm3 = vweird.f32 %v2079_v31  ;;  %v939_v34 = vand.u32 2147483647, %v2079_v31  ;;  %v941_v16 = vand.u32 2147483648, %v2079_v31 }
  0xdd   : > { %v931_v20 = vmul.f32 %v1553_v15, %v2079_v31  ;;  %1237 = vst [vmem:[%s2085_s26 + $0x8] sm:$0xff] %v1205_v0  ;;  %v923_v46 = vsel %vm922_vm2, %v1547_v30, %v919_v12  ;;  %v694_v21 = vadd.f32 %v1549_v39, %v693_v14  ;;  %vm936_vm4 = vweird.f32 %v1553_v15 }
  0xde   : > { %v1555_v23 = vpop.eup %1554  ;;  %v928_v45 = vsel %vm2088_vm13, %v2069_v17, %v923_v46  ;;  %vm2130_vm6 = vcmp.eq.f32.partialorder %v939_v34, 8.507059e+37  ;;  %v942_v28 = vor.u32 1.1754944e-38, %v941_v16  ;;  %v1158_v29 = vsub.f32 %v518_v47, %v1933_v56  ;;  %vm937_vm9 = vmor %vm935_vm3, %vm936_vm4 }
  0xdf   : > { %v932_v22 = vsub.f32 1.0, %v931_v20  ;;  %v1189_v30 = vmul.f32 %v2053_v7, %v928_v45  ;;  %v2136_v32 = vadd.f32 1.0, %v1555_v23  ;;  %v698_v35 = vsel %vm697_vm5, %v1549_v39, %v694_v21  ;;  %v378_v6 = vpop.f32.mrf.mxu2 }
  0xe0   : > { %v1557_v43 = vpop.eup %1556  ;;  %v703_v17 = vsel %vm2101_vm0, %v702_v1, %v698_v35  ;;  %v471_v5 = vadd.f32 %v470_v19, %v1990_v33  ;;  %v433_v36 = vadd.f32 %v432_v24, %v1990_v33  ;;  %v339_v37 = vadd.f32 %v338_v26, %v1995_v44  ;;  %v472_v1 = vpop.f32.mrf.mxu3 }
  0xe1   : > { %v1559_v38 = vpop.eup %1558  ;;  %v706_v10 = vmul.f32 %v1557_v43, %v2105_v49  ;;  %v1221_v40 = vadd.f32 %v1189_v30, %v1914_v48  ;;  %1560 = vrcp.f32 %v2136_v32  ;;  %v1174_v7 = vmul.f32 %v1142_v51, %v703_v17 }
  0xe2   : > { %v2146_v39 = vadd.f32 1.0, %v1559_v38  ;;  %v933_v41 = vmul.f32 %v1553_v15, %v932_v22  ;;  %v1437_v42 = vmul.f32 -1.442695, %v471_v5  ;;  %v1422_v50 = vmul.f32 -1.442695, %v433_v36  ;;  %v435_v20 = vpop.f32.mrf.mxu1  ;;  %v341_v22 = vpop.f32.mrf.mxu0 }
  0xe3   : > { %v707_v52 = vsub.f32 1.0, %v706_v10  ;;  %1253 = vst [vmem:[%s2085_s26 + $0x88] sm:$0xff] %v1221_v40  ;;  %v1206_v53 = vadd.f32 %v1174_v7, %v1927_v54  ;;  %v503_v58 = vmax.f32 %v339_v37, 0.0  ;;  %vm710_vm7 = vweird.f32 %v2105_v49 }
  0xe4   : > { %1562 = vrcp.f32 %v2146_v39  ;;  %v934_v48 = vadd.f32 %v1553_v15, %v933_v41  ;;  %vm711_vm8 = vweird.f32 %v1557_v43  ;;  %v714_v18 = vand.u32 2147483647, %v2105_v49 }
  0xe5   : > { %1238 = vst [vmem:[%s2085_s26 + $0x10] sm:$0xff] %v1206_v53  ;;  %1564 = vpow2.f32 %v1437_v42  ;;  %v708_v59 = vmul.f32 %v1557_v43, %v707_v52  ;;  %v716_v8 = vand.u32 2147483648, %v2105_v49  ;;  %v1143_v54 = vsub.f32 %v503_v58, %v1930_v55  ;;  %vm712_vm12 = vmor %vm710_vm7, %vm711_vm8 }
  0xe6   : > { %v938_v9 = vsel %vm937_vm9, %v1553_v15, %v934_v48  ;;  %1566 = vpow2.f32 %v1422_v50  ;;  %vm2159_vm10 = vcmp.eq.f32.partialorder %v714_v18, 8.507059e+37  ;;  %v379_v25 = vadd.f32 %v378_v6, %v1995_v44 }
  0xe7   : > { %v1561_v51 = vpop.eup %1560  ;;  %v943_v31 = vsel %vm2130_vm6, %v942_v28, %v938_v9  ;;  %v709_v13 = vadd.f32 %v1557_v43, %v708_v59  ;;  %v717_v0 = vor.u32 1.1754944e-38, %v716_v8  ;;  %vm950_vm11 = vweird.f32 %v2136_v32  ;;  %v381_v42 = vpop.f32.mrf.mxu2 }
  0xe8   : > { %v946_v12 = vmul.f32 %v1561_v51, %v2136_v32  ;;  %v1190_v14 = vmul.f32 %v1158_v29, %v943_v31  ;;  %v519_v15 = vmax.f32 %v379_v25, 0.0  ;;  %vm951_vm13 = vweird.f32 %v1561_v51  ;;  %v475_v48 = vpop.f32.mrf.mxu3 }
  0xe9   : > { %v713_v47 = vsel %vm712_vm12, %v1557_v43, %v709_v13  ;;  %v954_v34 = vand.u32 2147483647, %v2136_v32  ;;  %v956_v16 = vand.u32 2147483648, %v2136_v32  ;;  %v473_v19 = vadd.f32 %v472_v1, %v1990_v33  ;;  %vm952_vm0 = vmor %vm950_vm11, %vm951_vm13 }
  0xea   : > { %v1563_v46 = vpop.eup %1562  ;;  %v947_v21 = vsub.f32 1.0, %v946_v12  ;;  %v1222_v24 = vadd.f32 %v1190_v14, %v1933_v56  ;;  %v718_v26 = vsel %vm2159_vm10, %v717_v0, %v713_v47  ;;  %v1159_v49 = vsub.f32 %v519_v15, %v1936_v57  ;;  %v343_v14 = vpop.f32.mrf.mxu0 }
  0xeb   : > { %v1565_v23 = vpop.eup %1564  ;;  %v721_v45 = vmul.f32 %v1563_v46, %v2146_v39  ;;  %v1175_v27 = vmul.f32 %v1143_v54, %v718_v26  ;;  %vm2179_vm14 = vcmp.eq.f32.partialorder %v954_v34, 8.507059e+37  ;;  %v957_v29 = vor.u32 1.1754944e-38, %v956_v16 }
  0xec   : > { %v1567_v30 = vpop.eup %1566  ;;  %1254 = vst [vmem:[%s2085_s26 + $0x90] sm:$0xff] %v1222_v24  ;;  %v2184_v35 = vadd.f32 1.0, %v1565_v23  ;;  %v948_v56 = vmul.f32 %v1561_v51, %v947_v21  ;;  %v1438_v43 = vmul.f32 -1.442695, %v473_v19  ;;  %v436_v17 = vadd.f32 %v435_v20, %v1990_v33 }
  0xed   : > { %v722_v5 = vsub.f32 1.0, %v721_v45  ;;  %v2187_v36 = vadd.f32 1.0, %v1567_v30  ;;  %v1207_v37 = vadd.f32 %v1175_v27, %v1930_v55  ;;  %v342_v38 = vadd.f32 %v341_v22, %v1995_v44 }
  0xee   : > { %1568 = vrcp.f32 %v2184_v35  ;;  %v949_v10 = vadd.f32 %v1561_v51, %v948_v56  ;;  %v1423_v40 = vmul.f32 -1.442695, %v436_v17  ;;  %vm725_vm15 = vweird.f32 %v2146_v39 }
  0xef   : > { %1570 = vrcp.f32 %v2187_v36  ;;  %1239 = vst [vmem:[%s2085_s26 + $0x18] sm:$0xff] %v1207_v37  ;;  %v504_v7 = vmax.f32 %v342_v38, 0.0  ;;  %v723_v41 = vmul.f32 %v1563_v46, %v722_v5  ;;  %vm726_vm1 = vweird.f32 %v1563_v46 }
  0xf0   : > { %v953_v55 = vsel %vm952_vm0, %v1561_v51, %v949_v10  ;;  %1572 = vpow2.f32 %v1438_v43  ;;  %v729_v50 = vand.u32 2147483647, %v2146_v39  ;;  %v731_v52 = vand.u32 2147483648, %v2146_v39  ;;  %vm727_vm2 = vmor %vm725_vm15, %vm726_vm1  ;;  %v437_v39 = vpop.f32.mrf.mxu1 }
  0xf1   : > { %v958_v53 = vsel %vm2179_vm14, %v957_v29, %v953_v55  ;;  %1574 = vpow2.f32 %v1423_v40  ;;  %v724_v58 = vadd.f32 %v1563_v46, %v723_v41  ;;  %v1144_v6 = vsub.f32 %v504_v7, %v1943_v60  ;;  %v383_v29 = vpop.f32.mrf.mxu2 }
  0xf2   : > { %v1191_v32 = vmul.f32 %v1159_v49, %v958_v53  ;;  %v732_v18 = vor.u32 1.1754944e-38, %v731_v52  ;;  %v382_v59 = vadd.f32 %v381_v42, %v1995_v44  ;;  %vm730_vm3 = vcmp.eq.f32.partialorder %v729_v50, 8.507059e+37  ;;  %v477_v50 = vpop.f32.mrf.mxu3 }
  0xf3   : > { %v728_v8 = vsel %vm727_vm2, %v1563_v46, %v724_v58  ;;  %v969_v54 = vand.u32 2147483647, %v2184_v35  ;;  %v971_v9 = vand.u32 2147483648, %v2184_v35  ;;  %vm965_vm4 = vweird.f32 %v2184_v35 }
  0xf4   : > { %v1569_v11 = vpop.eup %1568  ;;  %v1223_v25 = vadd.f32 %v1191_v32, %v1936_v57  ;;  %v733_v1 = vsel %vm730_vm3, %v732_v18, %v728_v8  ;;  %v476_v51 = vadd.f32 %v475_v48, %v1990_v33  ;;  %v520_v12 = vmax.f32 %v382_v59, 0.0 }
  0xf5   : > { %v1571_v31 = vpop.eup %1570  ;;  %v961_v13 = vmul.f32 %v1569_v11, %v2184_v35  ;;  %v1176_v0 = vmul.f32 %v1144_v6, %v733_v1  ;;  %vm966_vm5 = vweird.f32 %v1569_v11  ;;  %vm2214_vm6 = vcmp.eq.f32.partialorder %v969_v54, 8.507059e+37 }
  0xf6   : > { %v1573_v15 = vpop.eup %1572  ;;  %v736_v47 = vmul.f32 %v1571_v31, %v2187_v36  ;;  %1255 = vst [vmem:[%s2085_s26 + $0x98] sm:$0xff] %v1223_v25  ;;  %v972_v34 = vor.u32 1.1754944e-38, %v971_v9  ;;  %v1439_v16 = vmul.f32 -1.442695, %v476_v51  ;;  %v438_v24 = vadd.f32 %v437_v39, %v1990_v33  ;;  %vm967_vm8 = vmor %vm965_vm4, %vm966_vm5 }
  0xf7   : > { %v1575_v19 = vpop.eup %1574  ;;  %v962_v20 = vsub.f32 1.0, %v961_v13  ;;  %v2218_v46 = vadd.f32 1.0, %v1573_v15  ;;  %v1208_v21 = vadd.f32 %v1176_v0, %v1943_v60  ;;  %v344_v23 = vadd.f32 %v343_v14, %v1995_v44  ;;  %v346_v13 = vpop.f32.mrf.mxu0 }
  0xf8   : > { %v737_v26 = vsub.f32 1.0, %v736_v47  ;;  %v2222_v49 = vadd.f32 1.0, %v1575_v19  ;;  %1576 = vpow2.f32 %v1439_v16  ;;  %v1160_v27 = vsub.f32 %v520_v12, %v1949_v62 }
  0xf9   : > { %1578 = vrcp.f32 %v2218_v46  ;;  %1240 = vst [vmem:[%s2085_s26 + $0x20] sm:$0xff] %v1208_v21  ;;  %v963_v45 = vmul.f32 %v1569_v11, %v962_v20  ;;  %v1424_v28 = vmul.f32 -1.442695, %v438_v24  ;;  %v505_v22 = vmax.f32 %v344_v23, 0.0  ;;  %v386_v16 = vpop.f32.mrf.mxu2 }
  0xfa   : > { %1580 = vrcp.f32 %v2222_v49  ;;  %v738_v60 = vmul.f32 %v1571_v31, %v737_v26  ;;  %vm741_vm7 = vweird.f32 %v1571_v31  ;;  %v744_v56 = vand.u32 2147483647, %v2187_v36 }
  0xfb   : > { %v964_v30 = vadd.f32 %v1569_v11, %v963_v45  ;;  %1582 = vpow2.f32 %v1424_v28  ;;  %v746_v43 = vand.u32 2147483648, %v2187_v36  ;;  %vm740_vm9 = vweird.f32 %v2187_v36  ;;  %v440_v36 = vpop.f32.mrf.mxu1 }
  0xfc   : > { %v739_v17 = vadd.f32 %v1571_v31, %v738_v60  ;;  %v1145_v5 = vsub.f32 %v505_v22, %v1946_v61  ;;  %v384_v37 = vadd.f32 %v383_v29, %v1995_v44  ;;  %vm742_vm10 = vmor %vm740_vm9, %vm741_vm7  ;;  %vm745_vm11 = vcmp.eq.f32.partialorder %v744_v56, 8.507059e+37  ;;  %v480_v60 = vpop.f32.mrf.mxu3 }
  0xfd   : > { %v968_v38 = vsel %vm967_vm8, %v1569_v11, %v964_v30  ;;  %v747_v10 = vor.u32 1.1754944e-38, %v746_v43  ;;  %v984_v40 = vand.u32 2147483647, %v2218_v46  ;;  %v986_v55 = vand.u32 2147483648, %v2218_v46 }
  0xfe   : > { %v1577_v7 = vpop.eup %1576  ;;  %v973_v41 = vsel %vm2214_vm6, %v972_v34, %v968_v38  ;;  %v743_v42 = vsel %vm742_vm10, %v1571_v31, %v739_v17  ;;  %v521_v35 = vmax.f32 %v384_v37, 0.0  ;;  %vm980_vm12 = vweird.f32 %v2218_v46 }
  0xff   : > { %v1579_v52 = vpop.eup %1578  ;;  %v1192_v53 = vmul.f32 %v1160_v27, %v973_v41  ;;  %v2241_v58 = vadd.f32 1.0, %v1577_v7  ;;  %v748_v6 = vsel %vm745_vm11, %v747_v10, %v743_v42  ;;  %vm2245_vm14 = vcmp.eq.f32.partialorder %v984_v40, 8.507059e+37 }
 0x100   : > { %v1581_v48 = vpop.eup %1580  ;;  %v976_v32 = vmul.f32 %v1579_v52, %v2218_v46  ;;  %v1177_v18 = vmul.f32 %v1145_v5, %v748_v6  ;;  %vm981_vm13 = vweird.f32 %v1579_v52  ;;  %v987_v8 = vor.u32 1.1754944e-38, %v986_v55 }
 0x101   : > { %v1583_v54 = vpop.eup %1582  ;;  %v751_v9 = vmul.f32 %v1581_v48, %v2222_v49  ;;  %v1224_v11 = vadd.f32 %v1192_v53, %v1949_v62  ;;  %1584 = vrcp.f32 %v2241_v58  ;;  %v1161_v25 = vsub.f32 %v521_v35, %v1952_v63  ;;  %vm982_vm1 = vmor %vm980_vm12, %vm981_vm13 }
 0x102   : > { %v977_v1 = vsub.f32 1.0, %v976_v32  ;;  %v2253_v51 = vadd.f32 1.0, %v1583_v54  ;;  %v1209_v39 = vadd.f32 %v1177_v18, %v1946_v61  ;;  %v478_v31 = vadd.f32 %v477_v50, %v1990_v33 }
 0x103   : > { %v752_v0 = vsub.f32 1.0, %v751_v9  ;;  %1256 = vst [vmem:[%s2085_s26 + $0xa0] sm:$0xff] %v1224_v11  ;;  %v441_v12 = vadd.f32 %v440_v36, %v1990_v33  ;;  %v347_v14 = vadd.f32 %v346_v13, %v1995_v44  ;;  %vm755_vm15 = vweird.f32 %v2222_v49  ;;  %v442_v46 = vpop.f32.mrf.mxu1  ;;  %v348_v36 = vpop.f32.mrf.mxu0 }
 0x104   : > { %1586 = vrcp.f32 %v2253_v51  ;;  %1241 = vst [vmem:[%s2085_s26 + $0x28] sm:$0xff] %v1209_v39  ;;  %v978_v62 = vmul.f32 %v1579_v52, %v977_v1  ;;  %v1440_v15 = vmul.f32 -1.442695, %v478_v31  ;;  %vm756_vm0 = vweird.f32 %v1581_v48 }
 0x105   : > { %v1425_v47 = vmul.f32 -1.442695, %v441_v12  ;;  %v506_v57 = vmax.f32 %v347_v14, 0.0  ;;  %v753_v61 = vmul.f32 %v1581_v48, %v752_v0  ;;  %v759_v34 = vand.u32 2147483647, %v2222_v49  ;;  %vm757_vm3 = vmor %vm755_vm15, %vm756_vm0  ;;  %v482_v14 = vpop.f32.mrf.mxu3 }
 0x106   : > { %v979_v19 = vadd.f32 %v1579_v52, %v978_v62  ;;  %1588 = vpow2.f32 %v1440_v15  ;;  %v761_v20 = vand.u32 2147483648, %v2222_v49  ;;  %v387_v21 = vadd.f32 %v386_v16, %v1995_v44 }
 0x107   : > { %v1585_v24 = vpop.eup %1584  ;;  %1590 = vpow2.f32 %v1425_v47  ;;  %v754_v26 = vadd.f32 %v1581_v48, %v753_v61  ;;  %vm2269_vm2 = vcmp.eq.f32.partialorder %v759_v34, 8.507059e+37  ;;  %v1146_v45 = vsub.f32 %v506_v57, %v1959_v2 }
 0x108   : > { %v991_v27 = vmul.f32 %v1585_v24, %v2241_v58  ;;  %v983_v28 = vsel %vm982_vm1, %v1579_v52, %v979_v19  ;;  %v762_v29 = vor.u32 1.1754944e-38, %v761_v20  ;;  %v522_v22 = vmax.f32 %v387_v21, 0.0 }
 0x109   : > { %v988_v30 = vsel %vm2245_vm14, %v987_v8, %v983_v28  ;;  %v758_v56 = vsel %vm757_vm3, %v1581_v48, %v754_v26  ;;  %vm995_vm4 = vweird.f32 %v2241_v58  ;;  %vm996_vm5 = vweird.f32 %v1585_v24 }
 0x10a   : > { %v2281_v43 = vpop.eup %1586  ;;  %v992_v17 = vsub.f32 1.0, %v991_v27  ;;  %v1193_v5 = vmul.f32 %v1161_v25, %v988_v30  ;;  %v763_v37 = vsel %vm2269_vm2, %v762_v29, %v758_v56  ;;  %v999_v49 = vand.u32 2147483647, %v2241_v58  ;;  %vm997_vm7 = vmor %vm995_vm4, %vm996_vm5  ;;  %v388_v25 = vpop.f32.mrf.mxu2 }
 0x10b   : > { %v766_v38 = vmul.f32 %v2281_v43, %v2253_v51  ;;  %v1178_v10 = vmul.f32 %v1146_v45, %v763_v37  ;;  %v1001_v40 = vand.u32 2147483648, %v2241_v58  ;;  %v1162_v7 = vsub.f32 %v522_v22, %v1965_v4  ;;  %v445_v62 = vpop.f32.mrf.mxu1  ;;  %v351_v22 = vpop.f32.mrf.mxu0  ;;  %v1656_v37 = vld [vmem:[%s1890_s27 + $0x38] sm:$0xff] }
 0x10c   : > { %v1589_v41 = vpop.eup %1588  ;;  %v1225_v42 = vadd.f32 %v1193_v5, %v1952_v63  ;;  %v993_v35 = vmul.f32 %v1585_v24, %v992_v17  ;;  %vm2291_vm6 = vcmp.eq.f32.partialorder %v999_v49, 8.507059e+37  ;;  %v481_v50 = vadd.f32 %v480_v60, %v1990_v33 }
 0x10d   : > { %v1591_v52 = vpop.eup %1590  ;;  %v767_v53 = vsub.f32 1.0, %v766_v38  ;;  %v2296_v6 = vadd.f32 1.0, %v1589_v41  ;;  %v1210_v48 = vadd.f32 %v1178_v10, %v1959_v2  ;;  %v1002_v32 = vor.u32 1.1754944e-38, %v1001_v40 }
 0x10e   : > { %1257 = vst [vmem:[%s2085_s26 + $0xa8] sm:$0xff] %v1225_v42  ;;  %v2300_v18 = vadd.f32 1.0, %v1591_v52  ;;  %v994_v63 = vadd.f32 %v1585_v24, %v993_v35  ;;  %v1441_v59 = vmul.f32 -1.442695, %v481_v50  ;;  %v443_v8 = vadd.f32 %v442_v46, %v1990_v33 }
 0x10f   : > { %1592 = vrcp.f32 %v2296_v6  ;;  %1242 = vst [vmem:[%s2085_s26 + $0x30] sm:$0xff] %v1210_v48  ;;  %v349_v54 = vadd.f32 %v348_v36, %v1995_v44  ;;  %v768_v9 = vmul.f32 %v2281_v43, %v767_v53  ;;  %vm770_vm8 = vweird.f32 %v2253_v51  ;;  %v1657_v36 = vld [vmem:[%s1890_s27 + $0xb8] sm:$0xff]  ;;  %v1658_v48 = vld [vmem:[%s1890_s27 + $0x40] sm:$0xff] }
 0x110   : > { %1594 = vrcp.f32 %v2300_v18  ;;  %v998_v2 = vsel %vm997_vm7, %v1585_v24, %v994_v63  ;;  %v1426_v11 = vmul.f32 -1.442695, %v443_v8  ;;  %vm771_vm9 = vweird.f32 %v2281_v43  ;;  %v485_v63 = vpop.f32.mrf.mxu3 }
 0x111   : > { %v1003_v1 = vsel %vm2291_vm6, %v1002_v32, %v998_v2  ;;  %1596 = vpow2.f32 %v1441_v59  ;;  %v507_v39 = vmax.f32 %v349_v54, 0.0  ;;  %v769_v58 = vadd.f32 %v2281_v43, %v768_v9  ;;  %vm2316_vm10 = vmor %vm770_vm8, %vm771_vm9 }
 0x112   : > { %v1194_v31 = vmul.f32 %v1162_v7, %v1003_v1  ;;  %1598 = vpow2.f32 %v1426_v11  ;;  %v774_v0 = vand.u32 2147483647, %v2253_v51  ;;  %v776_v12 = vand.u32 2147483648, %v2253_v51  ;;  %v391_v42 = vpop.f32.mrf.mxu2 }
 0x113   : > { %v773_v15 = vsel %vm2316_vm10, %v2281_v43, %v769_v58  ;;  %v1147_v47 = vsub.f32 %v507_v39, %v1962_v3  ;;  %v389_v57 = vadd.f32 %v388_v25, %v1995_v44  ;;  %vm1010_vm11 = vweird.f32 %v2296_v6  ;;  %v447_v58 = vpop.f32.mrf.mxu1 }
 0x114   : > { %v1226_v61 = vadd.f32 %v1194_v31, %v1965_v4  ;;  %v777_v34 = vor.u32 1.1754944e-38, %v776_v12  ;;  %v1014_v16 = vand.u32 2147483647, %v2296_v6  ;;  %vm775_vm12 = vcmp.eq.f32.partialorder %v774_v0, 8.507059e+37  ;;  %v2369_v12 = vld [vmem:[%s1890_s27 + $0xc0] sm:$0xff] }
 0x115   : > { %v1593_v19 = vpop.eup %1592  ;;  %v1016_v51 = vand.u32 2147483648, %v2296_v6  ;;  %v483_v20 = vadd.f32 %v482_v14, %v1990_v33  ;;  %v446_v21 = vadd.f32 %v445_v62, %v1990_v33  ;;  %v523_v4 = vmax.f32 %v389_v57, 0.0  ;;  %v353_v62 = vpop.f32.mrf.mxu0 }
 0x116   : > { %v1595_v24 = vpop.eup %1594  ;;  %v1006_v3 = vmul.f32 %v1593_v19, %v2296_v6  ;;  %1258 = vst [vmem:[%s2085_s26 + $0xb0] sm:$0xff] %v1226_v61  ;;  %v778_v26 = vsel %vm775_vm12, %v777_v34, %v773_v15  ;;  %vm1011_vm13 = vweird.f32 %v1593_v19  ;;  %vm2336_vm14 = vcmp.eq.f32.partialorder %v1014_v16, 8.507059e+37 }
 0x117   : > { %v1597_v23 = vpop.eup %1596  ;;  %v781_v45 = vmul.f32 %v1595_v24, %v2300_v18  ;;  %v1179_v27 = vmul.f32 %v1147_v47, %v778_v26  ;;  %v1017_v29 = vor.u32 1.1754944e-38, %v1016_v51  ;;  %v1442_v56 = vmul.f32 -1.442695, %v483_v20  ;;  %vm1012_vm1 = vmor %vm1010_vm11, %vm1011_vm13 }
 0x118   : > { %v1599_v60 = vpop.eup %1598  ;;  %v1007_v46 = vsub.f32 1.0, %v1006_v3  ;;  %v2340_v30 = vadd.f32 1.0, %v1597_v23  ;;  %v1427_v43 = vmul.f32 -1.442695, %v446_v21  ;;  %v352_v38 = vadd.f32 %v351_v22, %v1995_v44 }
 0x119   : > { %v782_v17 = vsub.f32 1.0, %v781_v45  ;;  %v2342_v5 = vadd.f32 1.0, %v1599_v60  ;;  %v1211_v49 = vadd.f32 %v1656_v37, %v1179_v27  ;;  %vm785_vm15 = vweird.f32 %v2300_v18 }
 0x11a   : > { %1600 = vrcp.f32 %v2340_v30  ;;  %v1008_v10 = vmul.f32 %v1593_v19, %v1007_v46  ;;  %vm786_vm0 = vweird.f32 %v1595_v24  ;;  %v508_v40 = vmax.f32 %v352_v38, 0.0  ;;  %v393_v27 = vpop.f32.mrf.mxu2 }
 0x11b   : > { %1602 = vrcp.f32 %v2342_v5  ;;  %1243 = vst [vmem:[%s2085_s26 + $0x38] sm:$0xff] %v1211_v49  ;;  %v783_v7 = vmul.f32 %v1595_v24, %v782_v17  ;;  %v789_v41 = vand.u32 2147483647, %v2300_v18  ;;  %v791_v55 = vand.u32 2147483648, %v2300_v18  ;;  %vm787_vm2 = vmor %vm785_vm15, %vm786_vm0 }
 0x11c   : > { %v1009_v35 = vadd.f32 %v1593_v19, %v1008_v10  ;;  %1604 = vpow2.f32 %v1442_v56  ;;  %v392_v50 = vadd.f32 %v391_v42, %v1995_v44  ;;  %v1163_v52 = vsub.f32 %v523_v4, %v1657_v36 }
 0x11d   : > { %1606 = vpow2.f32 %v1427_v43  ;;  %v784_v53 = vadd.f32 %v1595_v24, %v783_v7  ;;  %v1148_v32 = vsub.f32 %v508_v40, %v1658_v48  ;;  %vm790_vm3 = vcmp.eq.f32.partialorder %v789_v41, 8.507059e+37  ;;  %v1660_v43 = vld [vmem:[%s1890_s27 + $0x48] sm:$0xff] }
 0x11e   : > { %v1013_v59 = vsel %vm1012_vm1, %v1593_v19, %v1009_v35  ;;  %v792_v8 = vor.u32 1.1754944e-38, %v791_v55  ;;  %v524_v54 = vmax.f32 %v392_v50, 0.0  ;;  %vm1025_vm4 = vweird.f32 %v2340_v30  ;;  %v487_v35 = vpop.f32.mrf.mxu3 }
 0x11f   : > { %v1018_v6 = vsel %vm2336_vm14, %v1017_v29, %v1013_v59  ;;  %v788_v9 = vsel %vm787_vm2, %v1595_v24, %v784_v53  ;;  %v1029_v2 = vand.u32 2147483647, %v2340_v30  ;;  %v1031_v39 = vand.u32 2147483648, %v2340_v30 }
 0x120   : > { %v1601_v11 = vpop.eup %1600  ;;  %v1195_v25 = vmul.f32 %v1163_v52, %v1018_v6  ;;  %v793_v1 = vsel %vm790_vm3, %v792_v8, %v788_v9  ;;  %v486_v18 = vadd.f32 %v485_v63, %v1990_v33  ;;  %v1164_v14 = vsub.f32 %v524_v54, %v2369_v12  ;;  %v1661_v9 = vld [vmem:[%s1890_s27 + $0xc8] sm:$0xff] }
 0x121   : > { %v1603_v31 = vpop.eup %1602  ;;  %v1021_v13 = vmul.f32 %v1601_v11, %v2340_v30  ;;  %v1180_v0 = vmul.f32 %v1148_v32, %v793_v1  ;;  %vm1026_vm5 = vweird.f32 %v1601_v11  ;;  %vm2373_vm6 = vcmp.eq.f32.partialorder %v1029_v2, 8.507059e+37 }
 0x122   : > { %v1605_v15 = vpop.eup %1604  ;;  %v796_v47 = vmul.f32 %v1603_v31, %v2342_v5  ;;  %v1227_v57 = vadd.f32 %v1657_v36, %v1195_v25  ;;  %v1443_v34 = vmul.f32 -1.442695, %v486_v18  ;;  %v448_v21 = vadd.f32 %v447_v58, %v1990_v33  ;;  %vm1027_vm8 = vmor %vm1025_vm4, %vm1026_vm5  ;;  %v356_v18 = vpop.f32.mrf.mxu0 }
 0x123   : > { %v1607_v16 = vpop.eup %1606  ;;  %v1022_v19 = vsub.f32 1.0, %v1021_v13  ;;  %v2377_v51 = vadd.f32 1.0, %v1605_v15  ;;  %v1212_v20 = vadd.f32 %v1658_v48, %v1180_v0  ;;  %v354_v26 = vadd.f32 %v353_v62, %v1995_v44 }
 0x124   : > { %v797_v24 = vsub.f32 1.0, %v796_v47  ;;  %1259 = vst [vmem:[%s2085_s26 + $0xb8] sm:$0xff] %v1227_v57  ;;  %v2381_v3 = vadd.f32 1.0, %v1607_v16  ;;  %1608 = vpow2.f32 %v1443_v34  ;;  %v1032_v23 = vor.u32 1.1754944e-38, %v1031_v39  ;;  %v396_v57 = vpop.f32.mrf.mxu2 }
 0x125   : > { %1610 = vrcp.f32 %v2377_v51  ;;  %1244 = vst [vmem:[%s2085_s26 + $0x40] sm:$0xff] %v1212_v20  ;;  %v1023_v4 = vmul.f32 %v1601_v11, %v1022_v19  ;;  %v1428_v45 = vmul.f32 -1.442695, %v448_v21  ;;  %v509_v28 = vmax.f32 %v354_v26, 0.0 }
 0x126   : > { %1612 = vrcp.f32 %v2381_v3  ;;  %v798_v29 = vmul.f32 %v1603_v31, %v797_v24  ;;  %vm801_vm7 = vweird.f32 %v1603_v31  ;;  %v804_v60 = vand.u32 2147483647, %v2342_v5  ;;  %v1662_v24 = vld [vmem:[%s1890_s27 + $0x50] sm:$0xff] }
 0x127   : > { %v1024_v22 = vadd.f32 %v1601_v11, %v1023_v4  ;;  %1614 = vpow2.f32 %v1428_v45  ;;  %v806_v46 = vand.u32 2147483648, %v2342_v5  ;;  %vm800_vm9 = vweird.f32 %v2342_v5  ;;  %v450_v5 = vpop.f32.mrf.mxu1 }
 0x128   : > { %v799_v56 = vadd.f32 %v1603_v31, %v798_v29  ;;  %v1149_v17 = vsub.f32 %v509_v28, %v1660_v43  ;;  %v394_v37 = vadd.f32 %v393_v27, %v1995_v44  ;;  %vm802_vm10 = vmor %vm800_vm9, %vm801_vm7  ;;  %vm805_vm11 = vcmp.eq.f32.partialorder %v804_v60, 8.507059e+37 }
 0x129   : > { %v1028_v49 = vsel %vm1027_vm8, %v1601_v11, %v1024_v22  ;;  %v807_v38 = vor.u32 1.1754944e-38, %v806_v46  ;;  %v1044_v10 = vand.u32 2147483647, %v2377_v51  ;;  %v1046_v42 = vand.u32 2147483648, %v2377_v51 }
 0x12a   : > { %v1609_v40 = vpop.eup %1608  ;;  %v1033_v7 = vsel %vm2373_vm6, %v1032_v23, %v1028_v49  ;;  %v803_v41 = vsel %vm802_vm10, %v1603_v31, %v799_v56  ;;  %v525_v30 = vmax.f32 %v394_v37, 0.0  ;;  %vm1040_vm12 = vweird.f32 %v2377_v51 }
 0x12b   : > { %v1611_v55 = vpop.eup %1610  ;;  %v1196_v50 = vmul.f32 %v1164_v14, %v1033_v7  ;;  %v2399_v36 = vadd.f32 1.0, %v1609_v40  ;;  %v808_v52 = vsel %vm805_vm11, %v807_v38, %v803_v41  ;;  %vm2403_vm14 = vcmp.eq.f32.partialorder %v1044_v10, 8.507059e+37  ;;  %v1663_v38 = vld [vmem:[%s1890_s27 + $0xd0] sm:$0xff] }
 0x12c   : > { %v1613_v53 = vpop.eup %1612  ;;  %v1036_v48 = vmul.f32 %v1611_v55, %v2377_v51  ;;  %v1181_v32 = vmul.f32 %v1149_v17, %v808_v52  ;;  %vm1041_vm13 = vweird.f32 %v1611_v55  ;;  %v1047_v59 = vor.u32 1.1754944e-38, %v1046_v42  ;;  %v490_v51 = vpop.f32.mrf.mxu3 }
 0x12d   : > { %v1615_v8 = vpop.eup %1614  ;;  %v811_v54 = vmul.f32 %v1613_v53, %v2381_v3  ;;  %v1228_v6 = vadd.f32 %v2369_v12, %v1196_v50  ;;  %1616 = vrcp.f32 %v2399_v36  ;;  %v1165_v2 = vsub.f32 %v525_v30, %v1661_v9  ;;  %vm1042_vm1 = vmor %vm1040_vm12, %vm1041_vm13 }
 0x12e   : > { %v1037_v11 = vsub.f32 1.0, %v1036_v48  ;;  %v2411_v25 = vadd.f32 1.0, %v1615_v8  ;;  %v1213_v1 = vadd.f32 %v1660_v43, %v1181_v32  ;;  %v488_v39 = vadd.f32 %v487_v35, %v1990_v33  ;;  %v358_v35 = vpop.f32.mrf.mxu0 }
 0x12f   : > { %v812_v58 = vsub.f32 1.0, %v811_v54  ;;  %1260 = vst [vmem:[%s2085_s26 + $0xc0] sm:$0xff] %v1228_v6  ;;  %v451_v31 = vadd.f32 %v450_v5, %v1990_v33  ;;  %v357_v13 = vadd.f32 %v356_v18, %v1995_v44  ;;  %vm815_vm15 = vweird.f32 %v2381_v3  ;;  %v452_v28 = vpop.f32.mrf.mxu1 }
 0x130   : > { %1618 = vrcp.f32 %v2411_v25  ;;  %1245 = vst [vmem:[%s2085_s26 + $0x48] sm:$0xff] %v1213_v1  ;;  %v1038_v0 = vmul.f32 %v1611_v55, %v1037_v11  ;;  %v1444_v12 = vmul.f32 -1.442695, %v488_v39  ;;  %vm816_vm0 = vweird.f32 %v1613_v53 }
 0x131   : > { %v1429_v14 = vmul.f32 -1.442695, %v451_v31  ;;  %v510_v62 = vmax.f32 %v357_v13, 0.0  ;;  %v813_v15 = vmul.f32 %v1613_v53, %v812_v58  ;;  %v819_v47 = vand.u32 2147483647, %v2381_v3  ;;  %vm817_vm3 = vmor %vm815_vm15, %vm816_vm0 }
 0x132   : > { %v1039_v61 = vadd.f32 %v1611_v55, %v1038_v0  ;;  %1620 = vpow2.f32 %v1444_v12  ;;  %v821_v34 = vand.u32 2147483648, %v2381_v3  ;;  %v397_v16 = vadd.f32 %v396_v57, %v1995_v44 }
 0x133   : > { %v1617_v19 = vpop.eup %1616  ;;  %1622 = vpow2.f32 %v1429_v14  ;;  %v814_v20 = vadd.f32 %v1613_v53, %v813_v15  ;;  %vm2426_vm2 = vcmp.eq.f32.partialorder %v819_v47, 8.507059e+37  ;;  %v1150_v26 = vsub.f32 %v510_v62, %v1662_v24  ;;  %v1664_v47 = vld [vmem:[%s1890_s27 + $0x58] sm:$0xff] }
 0x134   : > { %v1051_v4 = vmul.f32 %v1617_v19, %v2399_v36  ;;  %v1043_v23 = vsel %vm1042_vm1, %v1611_v55, %v1039_v61  ;;  %v822_v45 = vor.u32 1.1754944e-38, %v821_v34  ;;  %v526_v27 = vmax.f32 %v397_v16, 0.0  ;;  %v492_v13 = vpop.f32.mrf.mxu3 }
 0x135   : > { %v1048_v29 = vsel %vm2403_vm14, %v1047_v59, %v1043_v23  ;;  %v818_v22 = vsel %vm817_vm3, %v1613_v53, %v814_v20  ;;  %vm1055_vm4 = vweird.f32 %v2399_v36  ;;  %vm1056_vm5 = vweird.f32 %v1617_v19 }
 0x136   : > { %v2438_v60 = vpop.eup %1618  ;;  %v1052_v46 = vsub.f32 1.0, %v1051_v4  ;;  %v1197_v56 = vmul.f32 %v1165_v2, %v1048_v29  ;;  %v823_v3 = vsel %vm2426_vm2, %v822_v45, %v818_v22  ;;  %v1059_v43 = vand.u32 2147483647, %v2399_v36  ;;  %vm1057_vm7 = vmor %vm1055_vm4, %vm1056_vm5  ;;  %v398_v2 = vpop.f32.mrf.mxu2 }
 0x137   : > { %v826_v17 = vmul.f32 %v2438_v60, %v2411_v25  ;;  %v1182_v37 = vmul.f32 %v1150_v26, %v823_v3  ;;  %v1061_v49 = vand.u32 2147483648, %v2399_v36  ;;  %v1166_v10 = vsub.f32 %v526_v27, %v1663_v38  ;;  %v455_v0 = vpop.f32.mrf.mxu1  ;;  %v361_v4 = vpop.f32.mrf.mxu0 }
 0x138   : > { %v1621_v40 = vpop.eup %1620  ;;  %v1229_v7 = vadd.f32 %v1661_v9, %v1197_v56  ;;  %v1053_v41 = vmul.f32 %v1617_v19, %v1052_v46  ;;  %vm2447_vm6 = vcmp.eq.f32.partialorder %v1059_v43, 8.507059e+37  ;;  %v491_v42 = vadd.f32 %v490_v51, %v1990_v33 }
 0x139   : > { %v1623_v5 = vpop.eup %1622  ;;  %v827_v55 = vsub.f32 1.0, %v826_v17  ;;  %v2452_v50 = vadd.f32 1.0, %v1621_v40  ;;  %v1214_v52 = vadd.f32 %v1662_v24, %v1182_v37  ;;  %v1062_v53 = vor.u32 1.1754944e-38, %v1061_v49 }
 0x13a   : > { %1261 = vst [vmem:[%s2085_s26 + $0xc8] sm:$0xff] %v1229_v7  ;;  %v2455_v48 = vadd.f32 1.0, %v1623_v5  ;;  %v1054_v32 = vadd.f32 %v1617_v19, %v1053_v41  ;;  %v1445_v63 = vmul.f32 -1.442695, %v491_v42  ;;  %v453_v59 = vadd.f32 %v452_v28, %v1990_v33  ;;  %v1665_v5 = vld [vmem:[%s1890_s27 + $0x60] sm:$0xff] }
 0x13b   : > { %1624 = vrcp.f32 %v2452_v50  ;;  %1246 = vst [vmem:[%s2085_s26 + $0x50] sm:$0xff] %v1214_v52  ;;  %v359_v8 = vadd.f32 %v358_v35, %v1995_v44  ;;  %v828_v54 = vmul.f32 %v2438_v60, %v827_v55  ;;  %vm830_vm8 = vweird.f32 %v2411_v25 }
 0x13c   : > { %1626 = vrcp.f32 %v2455_v48  ;;  %v1058_v6 = vsel %vm1057_vm7, %v1617_v19, %v1054_v32  ;;  %v1430_v9 = vmul.f32 -1.442695, %v453_v59  ;;  %vm831_vm9 = vweird.f32 %v2438_v60  ;;  %v495_v52 = vpop.f32.mrf.mxu3  ;;  %v1666_v32 = vld [vmem:[%s1890_s27 + $0xd8] sm:$0xff] }
 0x13d   : > { %v1063_v11 = vsel %vm2447_vm6, %v1062_v53, %v1058_v6  ;;  %1628 = vpow2.f32 %v1445_v63  ;;  %v511_v36 = vmax.f32 %v359_v8, 0.0  ;;  %v829_v1 = vadd.f32 %v2438_v60, %v828_v54  ;;  %vm2471_vm10 = vmor %vm830_vm8, %vm831_vm9 }
 0x13e   : > { %v1198_v39 = vmul.f32 %v1166_v10, %v1063_v11  ;;  %1630 = vpow2.f32 %v1430_v9  ;;  %v834_v58 = vand.u32 2147483647, %v2411_v25  ;;  %v836_v31 = vand.u32 2147483648, %v2411_v25  ;;  %v401_v40 = vpop.f32.mrf.mxu2 }
 0x13f   : > { %v833_v12 = vsel %vm2471_vm10, %v2438_v60, %v829_v1  ;;  %v399_v14 = vadd.f32 %v398_v2, %v1995_v44  ;;  %v1151_v57 = vsub.f32 %v511_v36, %v1664_v47  ;;  %v1074_v61 = vand.u32 2147483647, %v2452_v50  ;;  %v457_v36 = vpop.f32.mrf.mxu1  ;;  %v363_v1 = vpop.f32.mrf.mxu0 }
 0x140   : > { %v1230_v62 = vadd.f32 %v1663_v38, %v1198_v39  ;;  %v837_v15 = vor.u32 1.1754944e-38, %v836_v31  ;;  %vm835_vm11 = vcmp.eq.f32.partialorder %v834_v58, 8.507059e+37  ;;  %vm1070_vm12 = vweird.f32 %v2452_v50 }
 0x141   : > { %v1625_v34 = vpop.eup %1624  ;;  %v493_v25 = vadd.f32 %v492_v13, %v1990_v33  ;;  %v456_v16 = vadd.f32 %v455_v0, %v1990_v33  ;;  %v527_v24 = vmax.f32 %v399_v14, 0.0  ;;  %v1076_v26 = vand.u32 2147483648, %v2452_v50  ;;  %v1667_v14 = vld [vmem:[%s1890_s27 + $0xe0] sm:$0xff] }
 0x142   : > { %v1627_v19 = vpop.eup %1626  ;;  %v1066_v20 = vmul.f32 %v1625_v34, %v2452_v50  ;;  %1262 = vst [vmem:[%s2085_s26 + $0xd0] sm:$0xff] %v1230_v62  ;;  %v838_v21 = vsel %vm835_vm11, %v837_v15, %v833_v12  ;;  %vm1071_vm13 = vweird.f32 %v1625_v34  ;;  %vm2490_vm14 = vcmp.eq.f32.partialorder %v1074_v61, 8.507059e+37 }
 0x143   : > { %v1629_v23 = vpop.eup %1628  ;;  %v841_v45 = vmul.f32 %v1627_v19, %v2455_v48  ;;  %v1183_v27 = vmul.f32 %v1151_v57, %v838_v21  ;;  %v1446_v60 = vmul.f32 -1.442695, %v493_v25  ;;  %v1431_v46 = vmul.f32 -1.442695, %v456_v16  ;;  %vm1072_vm1 = vmor %vm1070_vm12, %vm1071_vm13 }
 0x144   : > { %v1631_v28 = vpop.eup %1630  ;;  %v1067_v29 = vsub.f32 1.0, %v1066_v20  ;;  %v2494_v22 = vadd.f32 1.0, %v1629_v23  ;;  %v362_v17 = vadd.f32 %v361_v4, %v1995_v44  ;;  %vm845_vm15 = vweird.f32 %v2455_v48 }
 0x145   : > { %v842_v56 = vsub.f32 1.0, %v841_v45  ;;  %v2496_v3 = vadd.f32 1.0, %v1631_v28  ;;  %v1215_v43 = vadd.f32 %v1664_v47, %v1183_v27  ;;  %vm846_vm0 = vweird.f32 %v1627_v19 }
 0x146   : > { %1632 = vrcp.f32 %v2494_v22  ;;  %v1068_v37 = vmul.f32 %v1625_v34, %v1067_v29  ;;  %v512_v49 = vmax.f32 %v362_v17, 0.0  ;;  %v849_v10 = vand.u32 2147483647, %v2455_v48  ;;  %vm847_vm2 = vmor %vm845_vm15, %vm846_vm0 }
 0x147   : > { %1634 = vrcp.f32 %v2496_v3  ;;  %1247 = vst [vmem:[%s2085_s26 + $0x58] sm:$0xff] %v1215_v43  ;;  %v843_v38 = vmul.f32 %v1627_v19, %v842_v56  ;;  %v851_v41 = vand.u32 2147483648, %v2455_v48  ;;  %v402_v30 = vadd.f32 %v401_v40, %v1995_v44 }
 0x148   : > { %v1069_v7 = vadd.f32 %v1625_v34, %v1068_v37  ;;  %1636 = vpow2.f32 %v1446_v60  ;;  %v1077_v42 = vor.u32 1.1754944e-38, %v1076_v26  ;;  %v1152_v55 = vsub.f32 %v512_v49, %v1665_v5  ;;  %v403_v26 = vpop.f32.mrf.mxu2  ;;  %v1668_v49 = vld [vmem:[%s1890_s27 + $0x68] sm:$0xff] }
 0x149   : > { %1638 = vpow2.f32 %v1431_v46  ;;  %v844_v35 = vadd.f32 %v1627_v19, %v843_v38  ;;  %v1167_v63 = vsub.f32 %v527_v24, %v1666_v32  ;;  %v852_v59 = vor.u32 1.1754944e-38, %v851_v41 }
 0x14a   : > { %v1073_v53 = vsel %vm1072_vm1, %v1625_v34, %v1069_v7  ;;  %v528_v8 = vmax.f32 %v402_v30, 0.0  ;;  %vm850_vm3 = vcmp.eq.f32.partialorder %v849_v10, 8.507059e+37  ;;  %vm1085_vm4 = vweird.f32 %v2494_v22  ;;  %v366_v10 = vpop.f32.mrf.mxu0  ;;  %v497_v30 = vpop.f32.mrf.mxu3 }
 0x14b   : > { %v1078_v54 = vsel %vm2490_vm14, %v1077_v42, %v1073_v53  ;;  %v848_v50 = vsel %vm847_vm2, %v1627_v19, %v844_v35  ;;  %v496_v11 = vadd.f32 %v495_v52, %v1990_v33  ;;  %v1089_v58 = vand.u32 2147483647, %v2494_v22 }
 0x14c   : > { %v1633_v6 = vpop.eup %1632  ;;  %v1199_v9 = vmul.f32 %v1167_v63, %v1078_v54  ;;  %v853_v2 = vsel %vm850_vm3, %v852_v59, %v848_v50  ;;  %v1091_v31 = vand.u32 2147483648, %v2494_v22  ;;  %v1168_v62 = vsub.f32 %v528_v8, %v1667_v14 }
 0x14d   : > { %v1635_v39 = vpop.eup %1634  ;;  %v1081_v48 = vmul.f32 %v1633_v6, %v2494_v22  ;;  %v1184_v18 = vmul.f32 %v1152_v55, %v853_v2  ;;  %v1447_v15 = vmul.f32 -1.442695, %v496_v11  ;;  %v458_v25 = vadd.f32 %v457_v36, %v1990_v33 }
 0x14e   : > { %v1637_v13 = vpop.eup %1636  ;;  %v856_v0 = vmul.f32 %v1635_v39, %v2496_v3  ;;  %v1231_v12 = vadd.f32 %v1666_v32, %v1199_v9  ;;  %v364_v20 = vadd.f32 %v363_v1, %v1995_v44  ;;  %vm1086_vm5 = vweird.f32 %v1633_v6 }
 0x14f   : > { %v1639_v47 = vpop.eup %1638  ;;  %v1082_v57 = vsub.f32 1.0, %v1081_v48  ;;  %v2523_v61 = vadd.f32 1.0, %v1637_v13  ;;  %v1216_v34 = vadd.f32 %v1665_v5, %v1184_v18  ;;  %1640 = vpow2.f32 %v1447_v15  ;;  %vm1087_vm7 = vmor %vm1085_vm4, %vm1086_vm5 }
 0x150   : > { %v857_v16 = vsub.f32 1.0, %v856_v0  ;;  %1263 = vst [vmem:[%s2085_s26 + $0xd8] sm:$0xff] %v1231_v12  ;;  %v2527_v19 = vadd.f32 1.0, %v1639_v47  ;;  %v1432_v24 = vmul.f32 -1.442695, %v458_v25  ;;  %v513_v4 = vmax.f32 %v364_v20, 0.0  ;;  %v406_v1 = vpop.f32.mrf.mxu2 }
 0x151   : > { %1642 = vrcp.f32 %v2523_v61  ;;  %1248 = vst [vmem:[%s2085_s26 + $0x60] sm:$0xff] %v1216_v34  ;;  %v1083_v21 = vmul.f32 %v1633_v6, %v1082_v57  ;;  %vm861_vm6 = vweird.f32 %v1635_v39  ;;  %v864_v27 = vand.u32 2147483647, %v2496_v3  ;;  %v1669_v12 = vld [vmem:[%s1890_s27 + $0x70] sm:$0xff]  ;;  %v1670_v47 = vld [vmem:[%s1890_s27 + $0xe8] sm:$0xff] }
 0x152   : > { %1644 = vrcp.f32 %v2527_v19  ;;  %v858_v23 = vmul.f32 %v1635_v39, %v857_v16  ;;  %v866_v51 = vand.u32 2147483648, %v2496_v3  ;;  %v1092_v28 = vor.u32 1.1754944e-38, %v1091_v31 }
 0x153   : > { %v1084_v45 = vadd.f32 %v1633_v6, %v1083_v21  ;;  %1646 = vpow2.f32 %v1432_v24  ;;  %vm860_vm8 = vweird.f32 %v2496_v3  ;;  %v404_v60 = vadd.f32 %v403_v26, %v1995_v44 }
 0x154   : > { %v859_v29 = vadd.f32 %v1635_v39, %v858_v23  ;;  %vm1090_vm9 = vcmp.eq.f32.partialorder %v1089_v58, 8.507059e+37  ;;  %vm862_vm10 = vmor %vm860_vm8, %vm861_vm6  ;;  %v867_v56 = vor.u32 1.1754944e-38, %v866_v51  ;;  %vm865_vm11 = vcmp.eq.f32.partialorder %v864_v27, 8.507059e+37 }
 0x155   : > { %v1088_v46 = vsel %vm1087_vm7, %v1633_v6, %v1084_v45  ;;  %v1641_v43 = vpop.eup %1640  ;;  %v1153_v38 = vsub.f32 %v513_v4, %v1668_v49  ;;  %v1104_v3 = vand.u32 2147483647, %v2523_v61  ;;  %v529_v55 = vmax.f32 %v404_v60, 0.0 }
 0x156   : > { %v1093_v17 = vsel %vm1090_vm9, %v1092_v28, %v1088_v46  ;;  %v863_v37 = vsel %vm862_vm10, %v1635_v39, %v859_v29  ;;  %v2540_v7 = vadd.f32 1.0, %v1641_v43  ;;  %v1106_v52 = vand.u32 2147483648, %v2523_v61 }
 0x157   : > { %v1643_v40 = vpop.eup %1642  ;;  %v1200_v22 = vmul.f32 %v1168_v62, %v1093_v17  ;;  %v868_v41 = vsel %vm865_vm11, %v867_v56, %v863_v37  ;;  %v498_v50 = vadd.f32 %v497_v30, %v1990_v33  ;;  %v367_v9 = vadd.f32 %v366_v10, %v1995_v44  ;;  %v1671_v17 = vld [vmem:[%s1890_s27 + $0xf0] sm:$0xff] }
 0x158   : > { %v1645_v42 = vpop.eup %1644  ;;  %v1096_v35 = vmul.f32 %v1643_v40, %v2523_v61  ;;  %v1185_v5 = vmul.f32 %v1153_v38, %v868_v41  ;;  %1648 = vrcp.f32 %v2540_v7  ;;  %vm1101_vm12 = vweird.f32 %v1643_v40 }
 0x159   : > { %v1647_v53 = vpop.eup %1646  ;;  %v871_v32 = vmul.f32 %v1645_v42, %v2527_v19  ;;  %v1232_v63 = vadd.f32 %v1667_v14, %v1200_v22  ;;  %vm875_vm13 = vweird.f32 %v2527_v19  ;;  %vm876_vm14 = vweird.f32 %v1645_v42 }
 0x15a   : > { %v1097_v59 = vsub.f32 1.0, %v1096_v35  ;;  %v2547_v8 = vadd.f32 1.0, %v1647_v53  ;;  %v1217_v54 = vadd.f32 %v1668_v49, %v1185_v5  ;;  %v1448_v11 = vmul.f32 -1.442695, %v498_v50  ;;  %vm877_vm2 = vmor %vm875_vm13, %vm876_vm14  ;;  %v408_v53 = vpop.f32.mrf.mxu2 }
 0x15b   : > { %v872_v6 = vsub.f32 1.0, %v871_v32  ;;  %1264 = vst [vmem:[%s2085_s26 + $0xe0] sm:$0xff] %v1232_v63  ;;  %v879_v36 = vand.u32 2147483647, %v2527_v19  ;;  %v514_v39 = vmax.f32 %v367_v9, 0.0  ;;  %v881_v33 = vand.u32 2147483648, %v2527_v19 }
 0x15c   : > { %1650 = vrcp.f32 %v2547_v8  ;;  %1249 = vst [vmem:[%s2085_s26 + $0x68] sm:$0xff] %v1217_v54  ;;  %v1098_v2 = vmul.f32 %v1643_v40, %v1097_v59  ;;  %v407_v18 = vadd.f32 %v406_v1, %v1995_v44  ;;  %vm1100_vm15 = vweird.f32 %v2523_v61  ;;  %v368_v61 = vpop.f32.mrf.mxu0 }
 0x15d   : > { %v873_v48 = vmul.f32 %v1645_v42, %v872_v6  ;;  %1652 = vpow2.f32 %v1448_v11  ;;  %vm1102_vm0 = vmor %vm1100_vm15, %vm1101_vm12  ;;  %vm1105_vm1 = vcmp.eq.f32.partialorder %v1104_v3, 8.507059e+37  ;;  %v1107_v13 = vor.u32 1.1754944e-38, %v1106_v52 }
 0x15e   : > { %v1099_v58 = vadd.f32 %v1643_v40, %v1098_v2  ;;  %v1649_v31 = vpop.eup %1648  ;;  %v1154_v14 = vsub.f32 %v514_v39, %v1669_v12  ;;  %v1169_v57 = vsub.f32 %v529_v55, %v1670_v47  ;;  %v882_v34 = vor.u32 1.1754944e-38, %v881_v33  ;;  %v1673_v33 = vld [vmem:[%s1890_s27 + $0xf8] sm:$0xff] }
 0x15f   : > { %v874_v0 = vadd.f32 %v1645_v42, %v873_v48  ;;  %v1111_v62 = vmul.f32 %v1649_v31, %v2540_v7  ;;  %vm880_vm3 = vcmp.eq.f32.partialorder %v879_v36, 8.507059e+37  ;;  %v530_v20 = vmax.f32 %v407_v18, 0.0 }
 0x160   : > { %v1103_v15 = vsel %vm1102_vm0, %v1643_v40, %v1099_v58  ;;  %v1121_v23 = vand.u32 2147483648, %v2540_v7  ;;  %vm1115_vm4 = vweird.f32 %v2540_v7  ;;  %v369_v19 = vadd.f32 %v368_v61, %v1995_v44 }
 0x161   : > { %v1108_v25 = vsel %vm1105_vm1, %v1107_v13, %v1103_v15  ;;  %v878_v16 = vsel %vm877_vm2, %v1645_v42, %v874_v0  ;;  %v1112_v24 = vsub.f32 1.0, %v1111_v62  ;;  %vm1116_vm5 = vweird.f32 %v1649_v31 }
 0x162   : > { %v1651_v21 = vpop.eup %1650  ;;  %v1201_v26 = vmul.f32 %v1169_v57, %v1108_v25  ;;  %v883_v4 = vsel %vm880_vm3, %v882_v34, %v878_v16  ;;  %v1119_v60 = vand.u32 2147483647, %v2540_v7  ;;  %v1170_v37 = vsub.f32 %v530_v20, %v1671_v17  ;;  %vm1117_vm7 = vmor %vm1115_vm4, %vm1116_vm5  ;;  %v1672_v7 = vld [vmem:[%s1890_s27 + $0x78] sm:$0xff] }
 0x163   : > { %v886_v45 = vmul.f32 %v1651_v21, %v2547_v8  ;;  %v1186_v27 = vmul.f32 %v1154_v14, %v883_v4  ;;  %v1653_v51 = vpop.eup %1652  ;;  %v1113_v29 = vmul.f32 %v1649_v31, %v1112_v24  ;;  %v1122_v38 = vor.u32 1.1754944e-38, %v1121_v23 }
 0x164   : > { %v1233_v28 = vadd.f32 %v1670_v47, %v1201_v26  ;;  %v659_v56 = vadd.f32 1.0, %v1653_v51  ;;  %vm891_vm6 = vweird.f32 %v1651_v21  ;;  %v896_v10 = vand.u32 2147483648, %v2547_v8 }
 0x165   : > { %v887_v46 = vsub.f32 1.0, %v886_v45  ;;  %v1218_v43 = vadd.f32 %v1669_v12, %v1186_v27  ;;  %v1114_v49 = vadd.f32 %v1649_v31, %v1113_v29  ;;  %v515_v40 = vmax.f32 %v369_v19, 0.0 }
 0x166   : > { %1265 = vst [vmem:[%s2085_s26 + $0xe8] sm:$0xff] %v1233_v28  ;;  %1654 = vrcp.f32 %v659_v56  ;;  %v894_v41 = vand.u32 2147483647, %v2547_v8  ;;  %vm1120_vm8 = vcmp.eq.f32.partialorder %v1119_v60, 8.507059e+37  ;;  %vm890_vm9 = vweird.f32 %v2547_v8 }
 0x167   : > { %1250 = vst [vmem:[%s2085_s26 + $0x70] sm:$0xff] %v1218_v43  ;;  %v888_v22 = vmul.f32 %v1651_v21, %v887_v46  ;;  %v1118_v3 = vsel %vm1117_vm7, %v1649_v31, %v1114_v49  ;;  %vm892_vm10 = vmor %vm890_vm9, %vm891_vm6  ;;  %v897_v5 = vor.u32 1.1754944e-38, %v896_v10  ;;  %v1155_v52 = vsub.f32 %v515_v40, %v1672_v7 }
 0x168   : > { %v1123_v30 = vsel %vm1120_vm8, %v1122_v38, %v1118_v3  ;;  %vm895_vm11 = vcmp.eq.f32.partialorder %v894_v41, 8.507059e+37  ;;  %v409_v6 = vadd.f32 %v408_v53, %v1995_v44  ;;  %v1136_v2 = vand.u32 2147483648, %v659_v56 }
 0x169   : > { %v889_v42 = vadd.f32 %v1651_v21, %v888_v22  ;;  %v1202_v35 = vmul.f32 %v1170_v37, %v1123_v30  ;;  %v1134_v1 = vand.u32 2147483647, %v659_v56  ;;  %vm1130_vm13 = vweird.f32 %v659_v56 }
 0x16a   : > { %v531_v11 = vmax.f32 %v409_v6, 0.0  ;;  %v1137_v44 = vor.u32 1.1754944e-38, %v1136_v2 }
 0x16b   : > { %v893_v55 = vsel %vm892_vm10, %v1651_v21, %v889_v42  ;;  %v1234_v32 = vadd.f32 %v1671_v17, %v1202_v35  ;;  %vm1135_vm15 = vcmp.eq.f32.partialorder %v1134_v1, 8.507059e+37 }
 0x16c   : > { %v898_v63 = vsel %vm895_vm11, %v897_v5, %v893_v55  ;;  %v1655_v59 = vpop.eup %1654  ;;  %v1171_v18 = vsub.f32 %v531_v11, %v1673_v33 }
 0x16d   : > { %v1187_v54 = vmul.f32 %v1155_v52, %v898_v63  ;;  %v1126_v50 = vmul.f32 %v1655_v59, %v659_v56  ;;  %1266 = vst [vmem:[%s2085_s26 + $0xf0] sm:$0xff] %v1234_v32  ;;  %vm1131_vm12 = vweird.f32 %v1655_v59 }
 0x16e   : > { %vm1132_vm14 = vmor %vm1130_vm13, %vm1131_vm12 }
 0x16f   : > { %v1219_v9 = vadd.f32 %v1672_v7, %v1187_v54  ;;  %v1127_v8 = vsub.f32 1.0, %v1126_v50 }
 0x171   : > { %1251 = vst [vmem:[%s2085_s26 + $0x78] sm:$0xff] %v1219_v9  ;;  %v1128_v36 = vmul.f32 %v1655_v59, %v1127_v8 }
 0x173   : > { %v1129_v39 = vadd.f32 %v1655_v59, %v1128_v36 }
 0x175   : > { %v1133_v48 = vsel %vm1132_vm14, %v1655_v59, %v1129_v39 }
 0x176   : > { %v1138_v58 = vsel %vm1135_vm15, %v1137_v44, %v1133_v48 }
 0x177   : > { %v1203_v31 = vmul.f32 %v1171_v18, %v1138_v58 }
 0x179   : > { %v1235_v13 = vadd.f32 %v1673_v33, %v1203_v31 }
 0x17b   : > { %1267 = vst [vmem:[%s2085_s26 + $0xf8] sm:$0xff] %v1235_v13 }
 0x17c   : > { %1701 = shalt.err (!%p1698_p3)
}
 0x17d   : > { %s1738_s19 = smov 128   ;;  %s1739_s20 = smov 8  }
 0x17e   : > { %1487 = dma.vmem_to_hbm [thread:$0]  (%p1798_p5), %s1282_s16, 4096, %s1284_s4, %s1269_s5, %s1738_s19, %s1738_s19, %s1739_s20  }
 0x17f PF: > { %p1493_p4 = scmp.ge.s32.totalorder %s1736_s15, 2  ;;  %s1298_s24 = sand.u32 1, %s1724_s12  }
 0x180   : > { %s1299_s25 = scalar_lea.sflag [#allocation3], %s1298_s24 }
 0x181   : > { %p1490_p7 = pnand %p1493_p4, %p1802_p6 }
 0x183   : > { %p1491_p8 = pneg %p1490_p7 }
 0x185   : > { %1719 = dma.done.wait (%p1491_p8), %s1299_s25, 4096  }
 0x186   : > { %1721 = vsyncadd (%p1491_p8), %s1299_s25, 4294963200  ;;  %p13_p9 = scmp.ge.s32.totalorder %s1785_s18, 4   ;;  %s2665_s12 = smov %s1728_s13 }
 0x187   : > { %s2666_s13 = smov %s1732_s14  ;;  %s2667_s14 = smov %s1796_s21 }
 0x188   : > { %s2668_s15 = smov %s1785_s18  ;;  %15 = sbr.rel (!%p13_p9) target bundleno = 3 (0x3), region = 67 }
 0x18d   :  { %1305 = vsyncpa [#allocation3], 1 }
 0x18e   :  { %1307 = vsyncpa [#allocation3 + $0x1], 1 }

</bundles_post_ra>
